<compile_context>
chip_gen: v6e
topology: v6e:2x2x1
jax: 0.10.0
libtpu: 0.0.40
codegen_flags: <defaults>
</compile_context>

<pallas_src>
import functools

import jax
import jax.numpy as jnp
from jax.experimental import pallas as pl
from jax.experimental.pallas import tpu as pltpu

EPS = 1e-5          # nn.LayerNorm default
NEG_INF = -1e20     # Python float (NOT a jax array -> nothing captured)


def _layernorm(z, gamma, beta):
    mu = jnp.mean(z, axis=-1, keepdims=True)
    var = jnp.mean((z - mu) ** 2, axis=-1, keepdims=True)
    return (z - mu) * jax.lax.rsqrt(var + EPS) * gamma + beta


def transformer_block_kernel(
    q_ref, k_ref, v_ref, mask_ref,
    wq_ref, wk_ref, wv_ref, wo_ref, bo_ref,
    g1_ref, b1_ref,
    wf1_ref, bf1_ref, wf2_ref, bf2_ref,
    g2_ref, b2_ref,
    o_ref,
    ctx_ref,                       # VMEM scratch (Tq, E) bf16: per-head context
    *, heads, head_dim, embed_size, ff_chunk,
):
    f32, bf16 = jnp.float32, jnp.bfloat16

    xq = q_ref[...]                        # (Tq, E) f32 -- residual base
    xq_b = xq.astype(bf16)
    xk_b = k_ref[...].astype(bf16)         # (Sk, E)
    xv_b = v_ref[...].astype(bf16)

    # QKV projections: bf16 operands on the MXU, f32 accumulation.
    q = jnp.dot(xq_b, wq_ref[...], preferred_element_type=f32).astype(bf16)
    k = jnp.dot(xk_b, wk_ref[...], preferred_element_type=f32).astype(bf16)
    v = jnp.dot(xv_b, wv_ref[...], preferred_element_type=f32).astype(bf16)

    # Key-padding mask: computed ONCE per grid step (hoisted out of head loop).
    masked = mask_ref[...] == 0.0          # (1, Sk) bool, broadcasts over rows
    inv_scale = 1.0 / (embed_size ** 0.5)  # PyTorch divides by sqrt(embed_size)

    # Per-head attention.  Static slices only; each head's context goes
    # straight to a VMEM scratch column block -> no lane-axis concatenate and
    # intermediates of head h are dead after the store.
    for h in range(heads):
        lo = h * head_dim
        hi = lo + head_dim
        qh = q[:, lo:hi]                   # (Tq, D) bf16
        kh = k[:, lo:hi]                   # (Sk, D)
        vh = v[:, lo:hi]                   # (Sk, D)
        # Contract the trailing dim of both operands -- no explicit transpose.
        energy = jax.lax.dot_general(
            qh, kh, dimension_numbers=(((1,), (1,)), ((), ())),
            preferred_element_type=f32)    # (Tq, Sk) f32
        logits = jnp.where(masked, NEG_INF, energy) * inv_scale
        m = jnp.max(logits, axis=-1, keepdims=True)
        p = jnp.exp(logits - m)
        denom = jnp.sum(p, axis=-1, keepdims=True)
        p = p * pl.reciprocal(denom, approx=True)      # EUP, not a VPU divide
        ctx_ref[:, lo:hi] = jnp.dot(
            p.astype(bf16), vh, preferred_element_type=f32).astype(bf16)

    # Output projection over all heads (full-E contraction).
    attn = jnp.dot(ctx_ref[...], wo_ref[...],
                   preferred_element_type=f32) + bo_ref[...]

    # residual + norm1 (f32)
    xn = _layernorm(attn + xq, g1_ref[...], b1_ref[...])
    xn_b = xn.astype(bf16)

    # Feed-forward (Linear -> ReLU -> Linear), chunked over the hidden dim F so
    # the (Tq, F) intermediate stays bounded at large E.
    F = wf1_ref.shape[1]
    f = jnp.zeros((xn.shape[0], embed_size), f32)
    for lo in range(0, F, ff_chunk):
        hi = lo + ff_chunk
        h1 = jnp.dot(xn_b, wf1_ref[:, lo:hi],
                     preferred_element_type=f32) + bf1_ref[:, lo:hi]
        h1 = jnp.maximum(h1, 0.0).astype(bf16)
        f = f + jnp.dot(h1, wf2_ref[lo:hi, :], preferred_element_type=f32)
    f = f + bf2_ref[...]

    # residual + norm2
    o_ref[...] = _layernorm(f + xn, g2_ref[...], b2_ref[...])


def transformer_block(value, key, query, mask, params, heads,
                      *, q_tile_target=256, ff_chunk_target=2048):
    """Mirrors TransformerBlock.forward(value, key, query, mask).

    value/key: (B, Sk, E) f32, query: (B, Sq, E) f32, mask: (B, 1, Sk) f32.
    """
    B, Sq, E = query.shape
    Sk = key.shape[1]
    assert value.shape == key.shape
    assert E % heads == 0
    D = E // heads
    F = params["wf1"].shape[1]

    # query-row tile (multiple of 8, or the full sequence)
    tq = q_tile_target if (Sq > q_tile_target and Sq % q_tile_target == 0) else Sq
    n_qt = Sq // tq
    # FFN hidden-dim chunk
    ff_chunk = ff_chunk_target if (F > ff_chunk_target and
                                   F % ff_chunk_target == 0) else F

    bf16 = jnp.bfloat16
    wq = params["wq"].astype(bf16)
    wk = params["wk"].astype(bf16)
    wv = params["wv"].astype(bf16)
    wo = params["wo"].astype(bf16)
    wf1 = params["wf1"].astype(bf16)
    wf2 = params["wf2"].astype(bf16)

    kernel = functools.partial(
        transformer_block_kernel,
        heads=heads, head_dim=D, embed_size=E, ff_chunk=ff_chunk)

    def const2d(shape):                    # grid-invariant weight / bias block
        return pl.BlockSpec(shape, lambda b, s: (0, 0))

    in_specs = [
        pl.BlockSpec((pl.Squeezed(), tq, E), lambda b, s: (b, s, 0)),   # query
        pl.BlockSpec((pl.Squeezed(), Sk, E), lambda b, s: (b, 0, 0)),   # key
        pl.BlockSpec((pl.Squeezed(), Sk, E), lambda b, s: (b, 0, 0)),   # value
        pl.BlockSpec((pl.Squeezed(), 1, Sk), lambda b, s: (b, 0, 0)),   # mask
        const2d((E, E)), const2d((E, E)), const2d((E, E)),              # wq wk wv
        const2d((E, E)), const2d((1, E)),                               # wo bo
        const2d((1, E)), const2d((1, E)),                               # g1 b1
        const2d((E, F)), const2d((1, F)),                               # wf1 bf1
        const2d((F, E)), const2d((1, E)),                               # wf2 bf2
        const2d((1, E)), const2d((1, E)),                               # g2 b2
    ]
    out_spec = pl.BlockSpec((pl.Squeezed(), tq, E), lambda b, s: (b, s, 0))

    # Advisory cost estimate for XLA's scheduler.
    flops = int(B * (2 * Sq * E * E                 # Q projection
                     + n_qt * 2 * 2 * Sk * E * E    # K,V proj (per query tile)
                     + 2 * 2 * Sq * Sk * E          # energy + PV (all heads)
                     + 2 * Sq * E * E               # output projection
                     + 2 * 2 * Sq * E * F))         # feed-forward
    transcendentals = int(B * heads * Sq * Sk + 4 * B * Sq)

    def _nbytes(a):
        return a.size * a.dtype.itemsize

    operands = (query, key, value, mask, wq, wk, wv, wo, params["bo"],
                params["g1"], params["b1"], wf1, params["bf1"],
                wf2, params["bf2"], params["g2"], params["b2"])
    bytes_accessed = int(sum(_nbytes(a) for a in operands) + B * Sq * E * 4)

    return pl.pallas_call(
        kernel,
        out_shape=jax.ShapeDtypeStruct((B, Sq, E), jnp.float32),
        grid=(B, n_qt),
        in_specs=in_specs,
        out_specs=out_spec,
        scratch_shapes=[pltpu.VMEM((tq, E), jnp.bfloat16)],
        compiler_params=pltpu.CompilerParams(
            dimension_semantics=("parallel", "parallel")),
        cost_estimate=pl.CostEstimate(
            flops=flops, transcendentals=transcendentals,
            bytes_accessed=bytes_accessed),
    )(*operands)


# ---------------- pure-JAX f32 reference (module semantics) ----------------
def _ref_transformer_block(value, key, query, mask, p, heads):
    B, Sq, E = query.shape
    Sk = key.shape[1]
    D = E // heads
    q = (query @ p["wq"]).reshape(B, Sq, heads, D)
    k = (key @ p["wk"]).reshape(B, Sk, heads, D)
    v = (value @ p["wv"]).reshape(B, Sk, heads, D)
    energy = jnp.einsum("nqhd,nkhd->nhqk", q, k)
    energy = jnp.where(mask[:, :, None, :] == 0.0, -1e20, energy)
    attention = jax.nn.softmax(energy / (E ** 0.5), axis=3)
    out = jnp.einsum("nhqk,nkhd->nqhd", attention, v).reshape(B, Sq, E)
    out = out @ p["wo"] + p["bo"]

    def ln(z, g, b):
        mu = z.mean(-1, keepdims=True)
        var = ((z - mu) ** 2).mean(-1, keepdims=True)
        return (z - mu) / jnp.sqrt(var + EPS) * g + b

    xn = ln(out + query, p["g1"], p["b1"])
    h = jax.nn.relu(xn @ p["wf1"] + p["bf1"])
    f = h @ p["wf2"] + p["bf2"]
    return ln(f + xn, p["g2"], p["b2"])


if __name__ == "__main__":
    B, S, E, H, FWD = 2, 8, 32, 4, 4
    F = FWD * E

    root = jax.random.PRNGKey(0)
    ks = jax.random.split(root, 13)

    def unif(k, shape, scale):
        return jax.random.uniform(k, shape, jnp.float32, -scale, scale)

    se = 1.0 / (E ** 0.5)
    sf = 1.0 / (F ** 0.5)
    params = {
        "wq": unif(ks[0], (E, E), se), "wk": unif(ks[1], (E, E), se),
        "wv": unif(ks[2], (E, E), se),
        "wo": unif(ks[3], (E, E), se), "bo": unif(ks[4], (1, E), se),
        "g1": jnp.ones((1, E), jnp.float32), "b1": jnp.zeros((1, E), jnp.float32),
        "wf1": unif(ks[5], (E, F), se), "bf1": unif(ks[6], (1, F), se),
        "wf2": unif(ks[7], (F, E), sf), "bf2": unif(ks[8], (1, E), sf),
        "g2": jnp.ones((1, E), jnp.float32), "b2": jnp.zeros((1, E), jnp.float32),
    }

    value = jax.random.normal(ks[9], (B, S, E), jnp.float32)
    key_in = jax.random.normal(ks[10], (B, S, E), jnp.float32)
    query = jax.random.normal(ks[11], (B, S, E), jnp.float32)
    # key-padding mask (B, 1, S); keep at least the first key valid
    mask = (jax.random.uniform(ks[12], (B, 1, S)) > 0.25).astype(jnp.float32)
    mask = mask.at[:, :, 0].set(1.0)

    out = transformer_block(value, key_in, query, mask, params, H)
    out = jax.block_until_ready(out)

    ref = _ref_transformer_block(value, key_in, query, mask, params, H)
    max_abs = float(jnp.max(jnp.abs(out - ref)))
    rel_fro = float(jnp.linalg.norm(out - ref) / jnp.linalg.norm(ref))
    # bf16 matmul operands + approx reciprocal => small, bounded deviation
    if not (max_abs < 5e-2 and rel_fro < 2e-2):
        raise AssertionError(
            f"Pallas output mismatch: max_abs={max_abs}, rel_fro={rel_fro}")

    print("KERNEL_OK")
</pallas_src>

<mosaic_0001>
module attributes {stable_mosaic.version = 11 : i64} {
  func.func @transformer_block_kernel(%arg0: i32, %arg1: i32, %arg2: memref<1x8x32xf32, #tpu.memory_space<vmem>>, %arg3: memref<1x8x32xf32, #tpu.memory_space<vmem>>, %arg4: memref<1x8x32xf32, #tpu.memory_space<vmem>>, %arg5: memref<1x1x8xf32, #tpu.memory_space<vmem>>, %arg6: memref<32x32xbf16, #tpu.memory_space<vmem>>, %arg7: memref<32x32xbf16, #tpu.memory_space<vmem>>, %arg8: memref<32x32xbf16, #tpu.memory_space<vmem>>, %arg9: memref<32x32xbf16, #tpu.memory_space<vmem>>, %arg10: memref<1x32xf32, #tpu.memory_space<vmem>>, %arg11: memref<1x32xf32, #tpu.memory_space<vmem>>, %arg12: memref<1x32xf32, #tpu.memory_space<vmem>>, %arg13: memref<32x128xbf16, #tpu.memory_space<vmem>>, %arg14: memref<1x128xf32, #tpu.memory_space<vmem>>, %arg15: memref<128x32xbf16, #tpu.memory_space<vmem>>, %arg16: memref<1x32xf32, #tpu.memory_space<vmem>>, %arg17: memref<1x32xf32, #tpu.memory_space<vmem>>, %arg18: memref<1x32xf32, #tpu.memory_space<vmem>>, %arg19: memref<1x8x32xf32, #tpu.memory_space<vmem>>, %arg20: memref<8x32xbf16, #tpu.memory_space<vmem>>) attributes {dimension_semantics = [#tpu.dimension_semantics<parallel>, #tpu.dimension_semantics<parallel>], iteration_bounds = array<i64: 2, 1>, scalar_prefetch = 0 : i64, scratch_operands = 1 : i64, tpu.core_type = #tpu.core_type<tc>, window_params = [{transform_indices = @transform_0, window_bounds = array<i64: 1, 8, 32>}, {transform_indices = @transform_1, window_bounds = array<i64: 1, 8, 32>}, {transform_indices = @transform_2, window_bounds = array<i64: 1, 8, 32>}, {transform_indices = @transform_3, window_bounds = array<i64: 1, 1, 8>}, {pipeline_mode = #tpu.pipeline_mode<synchronous>, transform_indices = @transform_4, window_bounds = array<i64: 32, 32>}, {pipeline_mode = #tpu.pipeline_mode<synchronous>, transform_indices = @transform_5, window_bounds = array<i64: 32, 32>}, {pipeline_mode = #tpu.pipeline_mode<synchronous>, transform_indices = @transform_6, window_bounds = array<i64: 32, 32>}, {pipeline_mode = #tpu.pipeline_mode<synchronous>, transform_indices = @transform_7, window_bounds = array<i64: 32, 32>}, {pipeline_mode = #tpu.pipeline_mode<synchronous>, transform_indices = @transform_8, window_bounds = array<i64: 1, 32>}, {pipeline_mode = #tpu.pipeline_mode<synchronous>, transform_indices = @transform_9, window_bounds = array<i64: 1, 32>}, {pipeline_mode = #tpu.pipeline_mode<synchronous>, transform_indices = @transform_10, window_bounds = array<i64: 1, 32>}, {pipeline_mode = #tpu.pipeline_mode<synchronous>, transform_indices = @transform_11, window_bounds = array<i64: 32, 128>}, {pipeline_mode = #tpu.pipeline_mode<synchronous>, transform_indices = @transform_12, window_bounds = array<i64: 1, 128>}, {pipeline_mode = #tpu.pipeline_mode<synchronous>, transform_indices = @transform_13, window_bounds = array<i64: 128, 32>}, {pipeline_mode = #tpu.pipeline_mode<synchronous>, transform_indices = @transform_14, window_bounds = array<i64: 1, 32>}, {pipeline_mode = #tpu.pipeline_mode<synchronous>, transform_indices = @transform_15, window_bounds = array<i64: 1, 32>}, {pipeline_mode = #tpu.pipeline_mode<synchronous>, transform_indices = @transform_16, window_bounds = array<i64: 1, 32>}, {transform_indices = @transform_17, window_bounds = array<i64: 1, 8, 32>}]} {
    %c0 = arith.constant 0 : index
    %c0_0 = arith.constant 0 : index
    %c0_1 = arith.constant 0 : index
    %0 = vector.load %arg2[%c0, %c0_0, %c0_1] : memref<1x8x32xf32, #tpu.memory_space<vmem>>, vector<1x8x32xf32>
    %1 = vector.shape_cast %0 : vector<1x8x32xf32> to vector<8x32xf32>
    %2 = arith.truncf %1 : vector<8x32xf32> to vector<8x32xbf16>
    %c0_2 = arith.constant 0 : index
    %c0_3 = arith.constant 0 : index
    %c0_4 = arith.constant 0 : index
    %3 = vector.load %arg3[%c0_2, %c0_3, %c0_4] : memref<1x8x32xf32, #tpu.memory_space<vmem>>, vector<1x8x32xf32>
    %4 = vector.shape_cast %3 : vector<1x8x32xf32> to vector<8x32xf32>
    %5 = arith.truncf %4 : vector<8x32xf32> to vector<8x32xbf16>
    %c0_5 = arith.constant 0 : index
    %c0_6 = arith.constant 0 : index
    %c0_7 = arith.constant 0 : index
    %6 = vector.load %arg4[%c0_5, %c0_6, %c0_7] : memref<1x8x32xf32, #tpu.memory_space<vmem>>, vector<1x8x32xf32>
    %7 = vector.shape_cast %6 : vector<1x8x32xf32> to vector<8x32xf32>
    %8 = arith.truncf %7 : vector<8x32xf32> to vector<8x32xbf16>
    %c0_8 = arith.constant 0 : index
    %c0_9 = arith.constant 0 : index
    %9 = vector.load %arg6[%c0_8, %c0_9] : memref<32x32xbf16, #tpu.memory_space<vmem>>, vector<32x32xbf16>
    %cst = arith.constant dense<0.000000e+00> : vector<8x32xf32>
    %10 = tpu.matmul %2, %9, %cst {dimension_numbers = #tpu.dot_dimension_numbers<[1], [0], [0], [1], [0, 0, 1, 1], [], []>} : vector<8x32xbf16>, vector<32x32xbf16>, vector<8x32xf32> -> vector<8x32xf32>
    %11 = arith.truncf %10 : vector<8x32xf32> to vector<8x32xbf16>
    %c0_10 = arith.constant 0 : index
    %c0_11 = arith.constant 0 : index
    %12 = vector.load %arg7[%c0_10, %c0_11] : memref<32x32xbf16, #tpu.memory_space<vmem>>, vector<32x32xbf16>
    %cst_12 = arith.constant dense<0.000000e+00> : vector<8x32xf32>
    %13 = tpu.matmul %5, %12, %cst_12 {dimension_numbers = #tpu.dot_dimension_numbers<[1], [0], [0], [1], [0, 0, 1, 1], [], []>} : vector<8x32xbf16>, vector<32x32xbf16>, vector<8x32xf32> -> vector<8x32xf32>
    %14 = arith.truncf %13 : vector<8x32xf32> to vector<8x32xbf16>
    %c0_13 = arith.constant 0 : index
    %c0_14 = arith.constant 0 : index
    %15 = vector.load %arg8[%c0_13, %c0_14] : memref<32x32xbf16, #tpu.memory_space<vmem>>, vector<32x32xbf16>
    %cst_15 = arith.constant dense<0.000000e+00> : vector<8x32xf32>
    %16 = tpu.matmul %8, %15, %cst_15 {dimension_numbers = #tpu.dot_dimension_numbers<[1], [0], [0], [1], [0, 0, 1, 1], [], []>} : vector<8x32xbf16>, vector<32x32xbf16>, vector<8x32xf32> -> vector<8x32xf32>
    %17 = arith.truncf %16 : vector<8x32xf32> to vector<8x32xbf16>
    %c0_16 = arith.constant 0 : index
    %c0_17 = arith.constant 0 : index
    %c0_18 = arith.constant 0 : index
    %18 = vector.load %arg5[%c0_16, %c0_17, %c0_18] : memref<1x1x8xf32, #tpu.memory_space<vmem>>, vector<1x1x8xf32>
    %19 = vector.shape_cast %18 : vector<1x1x8xf32> to vector<1x8xf32>
    %cst_19 = arith.constant 0.000000e+00 : f32
    %20 = vector.broadcast %cst_19 : f32 to vector<1x8xf32>
    %21 = arith.cmpf oeq, %19, %20 : vector<1x8xf32>
    %22 = vector.extract_strided_slice %11 {offsets = [0, 0], sizes = [8, 8], strides = [1, 1]} : vector<8x32xbf16> to vector<8x8xbf16>
    %23 = vector.extract_strided_slice %14 {offsets = [0, 0], sizes = [8, 8], strides = [1, 1]} : vector<8x32xbf16> to vector<8x8xbf16>
    %24 = vector.extract_strided_slice %17 {offsets = [0, 0], sizes = [8, 8], strides = [1, 1]} : vector<8x32xbf16> to vector<8x8xbf16>
    %cst_20 = arith.constant dense<0.000000e+00> : vector<8x8xf32>
    %25 = tpu.matmul %22, %23, %cst_20 {dimension_numbers = #tpu.dot_dimension_numbers<[1], [1], [0], [0], [0, 0, 1, 0], [], []>} : vector<8x8xbf16>, vector<8x8xbf16>, vector<8x8xf32> -> vector<8x8xf32>
    %cst_21 = arith.constant -1.000000e+20 : f32
    %26 = vector.shape_cast %21 : vector<1x8xi1> to vector<1x8xi1>
    %27 = vector.broadcast %26 : vector<1x8xi1> to vector<8x8xi1>
    %28 = vector.broadcast %cst_21 : f32 to vector<8x8xf32>
    %29 = arith.select %27, %28, %25 : vector<8x8xi1>, vector<8x8xf32>
    %cst_22 = arith.constant 0.176776692 : f32
    %30 = vector.broadcast %cst_22 : f32 to vector<8x8xf32>
    %31 = arith.mulf %29, %30 : vector<8x8xf32>
    %cst_23 = arith.constant dense<0xFF800000> : vector<8xf32>
    %32 = vector.multi_reduction <maximumf>, %31, %cst_23 [1] : vector<8x8xf32> to vector<8xf32>
    %33 = vector.shape_cast %32 : vector<8xf32> to vector<8x1xf32>
    %34 = vector.broadcast %33 : vector<8x1xf32> to vector<8x8xf32>
    %35 = arith.subf %31, %34 : vector<8x8xf32>
    %36 = math.exp %35 : vector<8x8xf32>
    %cst_24 = arith.constant dense<0.000000e+00> : vector<8xf32>
    %37 = vector.multi_reduction <add>, %36, %cst_24 [1] : vector<8x8xf32> to vector<8xf32>
    %38 = vector.shape_cast %37 : vector<8xf32> to vector<8x1xf32>
    %39 = tpu.reciprocal %38 {approx = true} : vector<8x1xf32> -> vector<8x1xf32>
    %40 = vector.broadcast %39 : vector<8x1xf32> to vector<8x8xf32>
    %41 = arith.mulf %36, %40 : vector<8x8xf32>
    %42 = arith.truncf %41 : vector<8x8xf32> to vector<8x8xbf16>
    %cst_25 = arith.constant dense<0.000000e+00> : vector<8x8xf32>
    %43 = tpu.matmul %42, %24, %cst_25 {dimension_numbers = #tpu.dot_dimension_numbers<[1], [0], [0], [1], [0, 0, 1, 1], [], []>} : vector<8x8xbf16>, vector<8x8xbf16>, vector<8x8xf32> -> vector<8x8xf32>
    %44 = arith.truncf %43 : vector<8x8xf32> to vector<8x8xbf16>
    %c0_26 = arith.constant 0 : index
    %c0_27 = arith.constant 0 : index
    %45 = vector.load %arg20[%c0_26, %c0_27] : memref<8x32xbf16, #tpu.memory_space<vmem>>, vector<8x8xbf16>
    tpu.vector_store %arg20[%c0_26, %c0_27], %44 {strides = array<i32>} : memref<8x32xbf16, #tpu.memory_space<vmem>>, vector<8x8xbf16>,
    %46 = vector.extract_strided_slice %11 {offsets = [0, 8], sizes = [8, 8], strides = [1, 1]} : vector<8x32xbf16> to vector<8x8xbf16>
    %47 = vector.extract_strided_slice %14 {offsets = [0, 8], sizes = [8, 8], strides = [1, 1]} : vector<8x32xbf16> to vector<8x8xbf16>
    %48 = vector.extract_strided_slice %17 {offsets = [0, 8], sizes = [8, 8], strides = [1, 1]} : vector<8x32xbf16> to vector<8x8xbf16>
    %cst_28 = arith.constant dense<0.000000e+00> : vector<8x8xf32>
    %49 = tpu.matmul %46, %47, %cst_28 {dimension_numbers = #tpu.dot_dimension_numbers<[1], [1], [0], [0], [0, 0, 1, 0], [], []>} : vector<8x8xbf16>, vector<8x8xbf16>, vector<8x8xf32> -> vector<8x8xf32>
    %cst_29 = arith.constant -1.000000e+20 : f32
    %50 = vector.shape_cast %21 : vector<1x8xi1> to vector<1x8xi1>
    %51 = vector.broadcast %50 : vector<1x8xi1> to vector<8x8xi1>
    %52 = vector.broadcast %cst_29 : f32 to vector<8x8xf32>
    %53 = arith.select %51, %52, %49 : vector<8x8xi1>, vector<8x8xf32>
    %cst_30 = arith.constant 0.176776692 : f32
    %54 = vector.broadcast %cst_30 : f32 to vector<8x8xf32>
    %55 = arith.mulf %53, %54 : vector<8x8xf32>
    %cst_31 = arith.constant dense<0xFF800000> : vector<8xf32>
    %56 = vector.multi_reduction <maximumf>, %55, %cst_31 [1] : vector<8x8xf32> to vector<8xf32>
    %57 = vector.shape_cast %56 : vector<8xf32> to vector<8x1xf32>
    %58 = vector.broadcast %57 : vector<8x1xf32> to vector<8x8xf32>
    %59 = arith.subf %55, %58 : vector<8x8xf32>
    %60 = math.exp %59 : vector<8x8xf32>
    %cst_32 = arith.constant dense<0.000000e+00> : vector<8xf32>
    %61 = vector.multi_reduction <add>, %60, %cst_32 [1] : vector<8x8xf32> to vector<8xf32>
    %62 = vector.shape_cast %61 : vector<8xf32> to vector<8x1xf32>
    %63 = tpu.reciprocal %62 {approx = true} : vector<8x1xf32> -> vector<8x1xf32>
    %64 = vector.broadcast %63 : vector<8x1xf32> to vector<8x8xf32>
    %65 = arith.mulf %60, %64 : vector<8x8xf32>
    %66 = arith.truncf %65 : vector<8x8xf32> to vector<8x8xbf16>
    %cst_33 = arith.constant dense<0.000000e+00> : vector<8x8xf32>
    %67 = tpu.matmul %66, %48, %cst_33 {dimension_numbers = #tpu.dot_dimension_numbers<[1], [0], [0], [1], [0, 0, 1, 1], [], []>} : vector<8x8xbf16>, vector<8x8xbf16>, vector<8x8xf32> -> vector<8x8xf32>
    %68 = arith.truncf %67 : vector<8x8xf32> to vector<8x8xbf16>
    %c0_34 = arith.constant 0 : index
    %c8 = arith.constant 8 : index
    %69 = vector.load %arg20[%c0_34, %c8] : memref<8x32xbf16, #tpu.memory_space<vmem>>, vector<8x8xbf16>
    tpu.vector_store %arg20[%c0_34, %c8], %68 {strides = array<i32>} : memref<8x32xbf16, #tpu.memory_space<vmem>>, vector<8x8xbf16>,
    %70 = vector.extract_strided_slice %11 {offsets = [0, 16], sizes = [8, 8], strides = [1, 1]} : vector<8x32xbf16> to vector<8x8xbf16>
    %71 = vector.extract_strided_slice %14 {offsets = [0, 16], sizes = [8, 8], strides = [1, 1]} : vector<8x32xbf16> to vector<8x8xbf16>
    %72 = vector.extract_strided_slice %17 {offsets = [0, 16], sizes = [8, 8], strides = [1, 1]} : vector<8x32xbf16> to vector<8x8xbf16>
    %cst_35 = arith.constant dense<0.000000e+00> : vector<8x8xf32>
    %73 = tpu.matmul %70, %71, %cst_35 {dimension_numbers = #tpu.dot_dimension_numbers<[1], [1], [0], [0], [0, 0, 1, 0], [], []>} : vector<8x8xbf16>, vector<8x8xbf16>, vector<8x8xf32> -> vector<8x8xf32>
    %cst_36 = arith.constant -1.000000e+20 : f32
    %74 = vector.shape_cast %21 : vector<1x8xi1> to vector<1x8xi1>
    %75 = vector.broadcast %74 : vector<1x8xi1> to vector<8x8xi1>
    %76 = vector.broadcast %cst_36 : f32 to vector<8x8xf32>
    %77 = arith.select %75, %76, %73 : vector<8x8xi1>, vector<8x8xf32>
    %cst_37 = arith.constant 0.176776692 : f32
    %78 = vector.broadcast %cst_37 : f32 to vector<8x8xf32>
    %79 = arith.mulf %77, %78 : vector<8x8xf32>
    %cst_38 = arith.constant dense<0xFF800000> : vector<8xf32>
    %80 = vector.multi_reduction <maximumf>, %79, %cst_38 [1] : vector<8x8xf32> to vector<8xf32>
    %81 = vector.shape_cast %80 : vector<8xf32> to vector<8x1xf32>
    %82 = vector.broadcast %81 : vector<8x1xf32> to vector<8x8xf32>
    %83 = arith.subf %79, %82 : vector<8x8xf32>
    %84 = math.exp %83 : vector<8x8xf32>
    %cst_39 = arith.constant dense<0.000000e+00> : vector<8xf32>
    %85 = vector.multi_reduction <add>, %84, %cst_39 [1] : vector<8x8xf32> to vector<8xf32>
    %86 = vector.shape_cast %85 : vector<8xf32> to vector<8x1xf32>
    %87 = tpu.reciprocal %86 {approx = true} : vector<8x1xf32> -> vector<8x1xf32>
    %88 = vector.broadcast %87 : vector<8x1xf32> to vector<8x8xf32>
    %89 = arith.mulf %84, %88 : vector<8x8xf32>
    %90 = arith.truncf %89 : vector<8x8xf32> to vector<8x8xbf16>
    %cst_40 = arith.constant dense<0.000000e+00> : vector<8x8xf32>
    %91 = tpu.matmul %90, %72, %cst_40 {dimension_numbers = #tpu.dot_dimension_numbers<[1], [0], [0], [1], [0, 0, 1, 1], [], []>} : vector<8x8xbf16>, vector<8x8xbf16>, vector<8x8xf32> -> vector<8x8xf32>
    %92 = arith.truncf %91 : vector<8x8xf32> to vector<8x8xbf16>
    %c0_41 = arith.constant 0 : index
    %c16 = arith.constant 16 : index
    %93 = vector.load %arg20[%c0_41, %c16] : memref<8x32xbf16, #tpu.memory_space<vmem>>, vector<8x8xbf16>
    tpu.vector_store %arg20[%c0_41, %c16], %92 {strides = array<i32>} : memref<8x32xbf16, #tpu.memory_space<vmem>>, vector<8x8xbf16>,
    %94 = vector.extract_strided_slice %11 {offsets = [0, 24], sizes = [8, 8], strides = [1, 1]} : vector<8x32xbf16> to vector<8x8xbf16>
    %95 = vector.extract_strided_slice %14 {offsets = [0, 24], sizes = [8, 8], strides = [1, 1]} : vector<8x32xbf16> to vector<8x8xbf16>
    %96 = vector.extract_strided_slice %17 {offsets = [0, 24], sizes = [8, 8], strides = [1, 1]} : vector<8x32xbf16> to vector<8x8xbf16>
    %cst_42 = arith.constant dense<0.000000e+00> : vector<8x8xf32>
    %97 = tpu.matmul %94, %95, %cst_42 {dimension_numbers = #tpu.dot_dimension_numbers<[1], [1], [0], [0], [0, 0, 1, 0], [], []>} : vector<8x8xbf16>, vector<8x8xbf16>, vector<8x8xf32> -> vector<8x8xf32>
    %cst_43 = arith.constant -1.000000e+20 : f32
    %98 = vector.shape_cast %21 : vector<1x8xi1> to vector<1x8xi1>
    %99 = vector.broadcast %98 : vector<1x8xi1> to vector<8x8xi1>
    %100 = vector.broadcast %cst_43 : f32 to vector<8x8xf32>
    %101 = arith.select %99, %100, %97 : vector<8x8xi1>, vector<8x8xf32>
    %cst_44 = arith.constant 0.176776692 : f32
    %102 = vector.broadcast %cst_44 : f32 to vector<8x8xf32>
    %103 = arith.mulf %101, %102 : vector<8x8xf32>
    %cst_45 = arith.constant dense<0xFF800000> : vector<8xf32>
    %104 = vector.multi_reduction <maximumf>, %103, %cst_45 [1] : vector<8x8xf32> to vector<8xf32>
    %105 = vector.shape_cast %104 : vector<8xf32> to vector<8x1xf32>
    %106 = vector.broadcast %105 : vector<8x1xf32> to vector<8x8xf32>
    %107 = arith.subf %103, %106 : vector<8x8xf32>
    %108 = math.exp %107 : vector<8x8xf32>
    %cst_46 = arith.constant dense<0.000000e+00> : vector<8xf32>
    %109 = vector.multi_reduction <add>, %108, %cst_46 [1] : vector<8x8xf32> to vector<8xf32>
    %110 = vector.shape_cast %109 : vector<8xf32> to vector<8x1xf32>
    %111 = tpu.reciprocal %110 {approx = true} : vector<8x1xf32> -> vector<8x1xf32>
    %112 = vector.broadcast %111 : vector<8x1xf32> to vector<8x8xf32>
    %113 = arith.mulf %108, %112 : vector<8x8xf32>
    %114 = arith.truncf %113 : vector<8x8xf32> to vector<8x8xbf16>
    %cst_47 = arith.constant dense<0.000000e+00> : vector<8x8xf32>
    %115 = tpu.matmul %114, %96, %cst_47 {dimension_numbers = #tpu.dot_dimension_numbers<[1], [0], [0], [1], [0, 0, 1, 1], [], []>} : vector<8x8xbf16>, vector<8x8xbf16>, vector<8x8xf32> -> vector<8x8xf32>
    %116 = arith.truncf %115 : vector<8x8xf32> to vector<8x8xbf16>
    %c0_48 = arith.constant 0 : index
    %c24 = arith.constant 24 : index
    %117 = vector.load %arg20[%c0_48, %c24] : memref<8x32xbf16, #tpu.memory_space<vmem>>, vector<8x8xbf16>
    tpu.vector_store %arg20[%c0_48, %c24], %116 {strides = array<i32>} : memref<8x32xbf16, #tpu.memory_space<vmem>>, vector<8x8xbf16>,
    %c0_49 = arith.constant 0 : index
    %c0_50 = arith.constant 0 : index
    %118 = vector.load %arg20[%c0_49, %c0_50] : memref<8x32xbf16, #tpu.memory_space<vmem>>, vector<8x32xbf16>
    %c0_51 = arith.constant 0 : index
    %c0_52 = arith.constant 0 : index
    %119 = vector.load %arg9[%c0_51, %c0_52] : memref<32x32xbf16, #tpu.memory_space<vmem>>, vector<32x32xbf16>
    %cst_53 = arith.constant dense<0.000000e+00> : vector<8x32xf32>
    %120 = tpu.matmul %118, %119, %cst_53 {dimension_numbers = #tpu.dot_dimension_numbers<[1], [0], [0], [1], [0, 0, 1, 1], [], []>} : vector<8x32xbf16>, vector<32x32xbf16>, vector<8x32xf32> -> vector<8x32xf32>
    %c0_54 = arith.constant 0 : index
    %c0_55 = arith.constant 0 : index
    %121 = vector.load %arg10[%c0_54, %c0_55] : memref<1x32xf32, #tpu.memory_space<vmem>>, vector<1x32xf32>
    %122 = vector.broadcast %121 : vector<1x32xf32> to vector<8x32xf32>
    %123 = arith.addf %120, %122 : vector<8x32xf32>
    %124 = arith.addf %123, %1 : vector<8x32xf32>
    %c0_56 = arith.constant 0 : index
    %c0_57 = arith.constant 0 : index
    %125 = vector.load %arg11[%c0_56, %c0_57] : memref<1x32xf32, #tpu.memory_space<vmem>>, vector<1x32xf32>
    %c0_58 = arith.constant 0 : index
    %c0_59 = arith.constant 0 : index
    %126 = vector.load %arg12[%c0_58, %c0_59] : memref<1x32xf32, #tpu.memory_space<vmem>>, vector<1x32xf32>
    %cst_60 = arith.constant dense<0.000000e+00> : vector<8xf32>
    %127 = vector.multi_reduction <add>, %124, %cst_60 [1] : vector<8x32xf32> to vector<8xf32>
    %128 = vector.shape_cast %127 : vector<8xf32> to vector<8x1xf32>
    %cst_61 = arith.constant 3.200000e+01 : f32
    %129 = vector.broadcast %cst_61 : f32 to vector<8x1xf32>
    %130 = arith.divf %128, %129 : vector<8x1xf32>
    %131 = vector.broadcast %130 : vector<8x1xf32> to vector<8x32xf32>
    %132 = arith.subf %124, %131 : vector<8x32xf32>
    %133 = arith.mulf %132, %132 : vector<8x32xf32>
    %cst_62 = arith.constant dense<0.000000e+00> : vector<8xf32>
    %134 = vector.multi_reduction <add>, %133, %cst_62 [1] : vector<8x32xf32> to vector<8xf32>
    %135 = vector.shape_cast %134 : vector<8xf32> to vector<8x1xf32>
    %cst_63 = arith.constant 3.200000e+01 : f32
    %136 = vector.broadcast %cst_63 : f32 to vector<8x1xf32>
    %137 = arith.divf %135, %136 : vector<8x1xf32>
    %138 = vector.broadcast %130 : vector<8x1xf32> to vector<8x32xf32>
    %139 = arith.subf %124, %138 : vector<8x32xf32>
    %cst_64 = arith.constant 9.99999974E-6 : f32
    %140 = vector.broadcast %cst_64 : f32 to vector<8x1xf32>
    %141 = arith.addf %137, %140 : vector<8x1xf32>
    %142 = math.rsqrt %141 : vector<8x1xf32>
    %143 = vector.broadcast %142 : vector<8x1xf32> to vector<8x32xf32>
    %144 = arith.mulf %139, %143 : vector<8x32xf32>
    %145 = vector.broadcast %125 : vector<1x32xf32> to vector<8x32xf32>
    %146 = arith.mulf %144, %145 : vector<8x32xf32>
    %147 = vector.broadcast %126 : vector<1x32xf32> to vector<8x32xf32>
    %148 = arith.addf %146, %147 : vector<8x32xf32>
    %149 = arith.truncf %148 : vector<8x32xf32> to vector<8x32xbf16>
    %cst_65 = arith.constant 0.000000e+00 : f32
    %150 = vector.broadcast %cst_65 : f32 to vector<8x32xf32>
    %c0_66 = arith.constant 0 : index
    %c0_67 = arith.constant 0 : index
    %151 = vector.load %arg13[%c0_66, %c0_67] : memref<32x128xbf16, #tpu.memory_space<vmem>>, vector<32x128xbf16>
    %cst_68 = arith.constant dense<0.000000e+00> : vector<8x128xf32>
    %152 = tpu.matmul %149, %151, %cst_68 {dimension_numbers = #tpu.dot_dimension_numbers<[1], [0], [0], [1], [0, 0, 1, 1], [], []>} : vector<8x32xbf16>, vector<32x128xbf16>, vector<8x128xf32> -> vector<8x128xf32>
    %c0_69 = arith.constant 0 : index
    %c0_70 = arith.constant 0 : index
    %153 = vector.load %arg14[%c0_69, %c0_70] : memref<1x128xf32, #tpu.memory_space<vmem>>, vector<1x128xf32>
    %154 = vector.broadcast %153 : vector<1x128xf32> to vector<8x128xf32>
    %155 = arith.addf %152, %154 : vector<8x128xf32>
    %cst_71 = arith.constant 0.000000e+00 : f32
    %156 = vector.broadcast %cst_71 : f32 to vector<8x128xf32>
    %157 = arith.maximumf %155, %156 : vector<8x128xf32>
    %158 = arith.truncf %157 : vector<8x128xf32> to vector<8x128xbf16>
    %c0_72 = arith.constant 0 : index
    %c0_73 = arith.constant 0 : index
    %159 = vector.load %arg15[%c0_72, %c0_73] : memref<128x32xbf16, #tpu.memory_space<vmem>>, vector<128x32xbf16>
    %cst_74 = arith.constant dense<0.000000e+00> : vector<8x32xf32>
    %160 = tpu.matmul %158, %159, %cst_74 {dimension_numbers = #tpu.dot_dimension_numbers<[1], [0], [0], [1], [0, 0, 1, 1], [], []>} : vector<8x128xbf16>, vector<128x32xbf16>, vector<8x32xf32> -> vector<8x32xf32>
    %161 = arith.addf %150, %160 : vector<8x32xf32>
    %c0_75 = arith.constant 0 : index
    %c0_76 = arith.constant 0 : index
    %162 = vector.load %arg16[%c0_75, %c0_76] : memref<1x32xf32, #tpu.memory_space<vmem>>, vector<1x32xf32>
    %163 = vector.broadcast %162 : vector<1x32xf32> to vector<8x32xf32>
    %164 = arith.addf %161, %163 : vector<8x32xf32>
    %165 = arith.addf %164, %148 : vector<8x32xf32>
    %c0_77 = arith.constant 0 : index
    %c0_78 = arith.constant 0 : index
    %166 = vector.load %arg17[%c0_77, %c0_78] : memref<1x32xf32, #tpu.memory_space<vmem>>, vector<1x32xf32>
    %c0_79 = arith.constant 0 : index
    %c0_80 = arith.constant 0 : index
    %167 = vector.load %arg18[%c0_79, %c0_80] : memref<1x32xf32, #tpu.memory_space<vmem>>, vector<1x32xf32>
    %cst_81 = arith.constant dense<0.000000e+00> : vector<8xf32>
    %168 = vector.multi_reduction <add>, %165, %cst_81 [1] : vector<8x32xf32> to vector<8xf32>
    %169 = vector.shape_cast %168 : vector<8xf32> to vector<8x1xf32>
    %cst_82 = arith.constant 3.200000e+01 : f32
    %170 = vector.broadcast %cst_82 : f32 to vector<8x1xf32>
    %171 = arith.divf %169, %170 : vector<8x1xf32>
    %172 = vector.broadcast %171 : vector<8x1xf32> to vector<8x32xf32>
    %173 = arith.subf %165, %172 : vector<8x32xf32>
    %174 = arith.mulf %173, %173 : vector<8x32xf32>
    %cst_83 = arith.constant dense<0.000000e+00> : vector<8xf32>
    %175 = vector.multi_reduction <add>, %174, %cst_83 [1] : vector<8x32xf32> to vector<8xf32>
    %176 = vector.shape_cast %175 : vector<8xf32> to vector<8x1xf32>
    %cst_84 = arith.constant 3.200000e+01 : f32
    %177 = vector.broadcast %cst_84 : f32 to vector<8x1xf32>
    %178 = arith.divf %176, %177 : vector<8x1xf32>
    %179 = vector.broadcast %171 : vector<8x1xf32> to vector<8x32xf32>
    %180 = arith.subf %165, %179 : vector<8x32xf32>
    %cst_85 = arith.constant 9.99999974E-6 : f32
    %181 = vector.broadcast %cst_85 : f32 to vector<8x1xf32>
    %182 = arith.addf %178, %181 : vector<8x1xf32>
    %183 = math.rsqrt %182 : vector<8x1xf32>
    %184 = vector.broadcast %183 : vector<8x1xf32> to vector<8x32xf32>
    %185 = arith.mulf %180, %184 : vector<8x32xf32>
    %186 = vector.broadcast %166 : vector<1x32xf32> to vector<8x32xf32>
    %187 = arith.mulf %185, %186 : vector<8x32xf32>
    %188 = vector.broadcast %167 : vector<1x32xf32> to vector<8x32xf32>
    %189 = arith.addf %187, %188 : vector<8x32xf32>
    %c0_86 = arith.constant 0 : index
    %c0_87 = arith.constant 0 : index
    %c0_88 = arith.constant 0 : index
    %190 = vector.load %arg19[%c0_86, %c0_87, %c0_88] : memref<1x8x32xf32, #tpu.memory_space<vmem>>, vector<1x8x32xf32>
    %191 = vector.shape_cast %190 : vector<1x8x32xf32> to vector<8x32xf32>
    %192 = vector.shape_cast %189 : vector<8x32xf32> to vector<1x8x32xf32>
    tpu.vector_store %arg19[%c0_86, %c0_87, %c0_88], %192 {strides = array<i32>} : memref<1x8x32xf32, #tpu.memory_space<vmem>>, vector<1x8x32xf32>,
    return
  }
  func.func @transform_0(%arg0: i32, %arg1: i32) -> (i32, i32, i32) {
    %c0_i32 = arith.constant 0 : i32
    %c0_i32_0 = arith.constant 0 : i32
    return %arg0, %arg1, %c0_i32 : i32, i32, i32
  }
  func.func @transform_1(%arg0: i32, %arg1: i32) -> (i32, i32, i32) {
    %c0_i32 = arith.constant 0 : i32
    %c0_i32_0 = arith.constant 0 : i32
    %c0_i32_1 = arith.constant 0 : i32
    return %arg0, %c0_i32, %c0_i32_0 : i32, i32, i32
  }
  func.func @transform_2(%arg0: i32, %arg1: i32) -> (i32, i32, i32) {
    %c0_i32 = arith.constant 0 : i32
    %c0_i32_0 = arith.constant 0 : i32
    %c0_i32_1 = arith.constant 0 : i32
    return %arg0, %c0_i32, %c0_i32_0 : i32, i32, i32
  }
  func.func @transform_3(%arg0: i32, %arg1: i32) -> (i32, i32, i32) {
    %c0_i32 = arith.constant 0 : i32
    %c0_i32_0 = arith.constant 0 : i32
    %c0_i32_1 = arith.constant 0 : i32
    return %arg0, %c0_i32, %c0_i32_0 : i32, i32, i32
  }
  func.func @transform_4(%arg0: i32, %arg1: i32) -> (i32, i32) {
    %c0_i32 = arith.constant 0 : i32
    %c0_i32_0 = arith.constant 0 : i32
    %c0_i32_1 = arith.constant 0 : i32
    return %c0_i32, %c0_i32_0 : i32, i32
  }
  func.func @transform_5(%arg0: i32, %arg1: i32) -> (i32, i32) {
    %c0_i32 = arith.constant 0 : i32
    %c0_i32_0 = arith.constant 0 : i32
    %c0_i32_1 = arith.constant 0 : i32
    return %c0_i32, %c0_i32_0 : i32, i32
  }
  func.func @transform_6(%arg0: i32, %arg1: i32) -> (i32, i32) {
    %c0_i32 = arith.constant 0 : i32
    %c0_i32_0 = arith.constant 0 : i32
    %c0_i32_1 = arith.constant 0 : i32
    return %c0_i32, %c0_i32_0 : i32, i32
  }
  func.func @transform_7(%arg0: i32, %arg1: i32) -> (i32, i32) {
    %c0_i32 = arith.constant 0 : i32
    %c0_i32_0 = arith.constant 0 : i32
    %c0_i32_1 = arith.constant 0 : i32
    return %c0_i32, %c0_i32_0 : i32, i32
  }
  func.func @transform_8(%arg0: i32, %arg1: i32) -> (i32, i32) {
    %c0_i32 = arith.constant 0 : i32
    %c0_i32_0 = arith.constant 0 : i32
    %c0_i32_1 = arith.constant 0 : i32
    return %c0_i32, %c0_i32_0 : i32, i32
  }
  func.func @transform_9(%arg0: i32, %arg1: i32) -> (i32, i32) {
    %c0_i32 = arith.constant 0 : i32
    %c0_i32_0 = arith.constant 0 : i32
    %c0_i32_1 = arith.constant 0 : i32
    return %c0_i32, %c0_i32_0 : i32, i32
  }
  func.func @transform_10(%arg0: i32, %arg1: i32) -> (i32, i32) {
    %c0_i32 = arith.constant 0 : i32
    %c0_i32_0 = arith.constant 0 : i32
    %c0_i32_1 = arith.constant 0 : i32
    return %c0_i32, %c0_i32_0 : i32, i32
  }
  func.func @transform_11(%arg0: i32, %arg1: i32) -> (i32, i32) {
    %c0_i32 = arith.constant 0 : i32
    %c0_i32_0 = arith.constant 0 : i32
    %c0_i32_1 = arith.constant 0 : i32
    return %c0_i32, %c0_i32_0 : i32, i32
  }
  func.func @transform_12(%arg0: i32, %arg1: i32) -> (i32, i32) {
    %c0_i32 = arith.constant 0 : i32
    %c0_i32_0 = arith.constant 0 : i32
    %c0_i32_1 = arith.constant 0 : i32
    return %c0_i32, %c0_i32_0 : i32, i32
  }
  func.func @transform_13(%arg0: i32, %arg1: i32) -> (i32, i32) {
    %c0_i32 = arith.constant 0 : i32
    %c0_i32_0 = arith.constant 0 : i32
    %c0_i32_1 = arith.constant 0 : i32
    return %c0_i32, %c0_i32_0 : i32, i32
  }
  func.func @transform_14(%arg0: i32, %arg1: i32) -> (i32, i32) {
    %c0_i32 = arith.constant 0 : i32
    %c0_i32_0 = arith.constant 0 : i32
    %c0_i32_1 = arith.constant 0 : i32
    return %c0_i32, %c0_i32_0 : i32, i32
  }
  func.func @transform_15(%arg0: i32, %arg1: i32) -> (i32, i32) {
    %c0_i32 = arith.constant 0 : i32
    %c0_i32_0 = arith.constant 0 : i32
    %c0_i32_1 = arith.constant 0 : i32
    return %c0_i32, %c0_i32_0 : i32, i32
  }
  func.func @transform_16(%arg0: i32, %arg1: i32) -> (i32, i32) {
    %c0_i32 = arith.constant 0 : i32
    %c0_i32_0 = arith.constant 0 : i32
    %c0_i32_1 = arith.constant 0 : i32
    return %c0_i32, %c0_i32_0 : i32, i32
  }
  func.func @transform_17(%arg0: i32, %arg1: i32) -> (i32, i32, i32) {
    %c0_i32 = arith.constant 0 : i32
    %c0_i32_0 = arith.constant 0 : i32
    return %arg0, %arg1, %c0_i32 : i32, i32, i32
  }
}

</mosaic_0001>

<bundles_post_ra>
// kernel: tpu_custom_call.1
= control target key start
LH: loop header
LB: loop body
LE: loop exit
PB: predicated region body
PF: predicated region fallthrough
CT: control target
= control target key end

     0   :  { %s2920_s0 = inlined_call_operand.vmem [shape: f32[2,8,32], index: 0, kind: input, shape index: {}]   ;;  %s2921_s1 = inlined_call_operand.vmem [shape: f32[2,8,32], index: 1, kind: input, shape index: {}]   ;;  %s2922_s2 = inlined_call_operand.vmem [shape: f32[2,8,32], index: 2, kind: input, shape index: {}]   ;;  %s2923_s3 = inlined_call_operand.hbm [shape: f32[2,1,8], index: 3, kind: input, shape index: {}]   ;;  %s2924_s4 = inlined_call_operand.vmem [shape: bf16[32,32], index: 4, kind: input, shape index: {}]   ;;  %s2925_s5 = inlined_call_operand.vmem [shape: bf16[32,32], index: 5, kind: input, shape index: {}]   ;;  %s2926_s6 = inlined_call_operand.hbm [shape: bf16[32,32], index: 6, kind: input, shape index: {}]   ;;  %s2927_s7 = inlined_call_operand.hbm [shape: bf16[32,32], index: 7, kind: input, shape index: {}]   ;;  %s2928_s8 = inlined_call_operand.hbm [shape: f32[1,32], index: 8, kind: input, shape index: {}]   ;;  %s2929_s9 = inlined_call_operand.hbm [shape: f32[1,32], index: 9, kind: input, shape index: {}]   ;;  %s2930_s10 = inlined_call_operand.vmem [shape: f32[1,32], index: 10, kind: input, shape index: {}]   ;;  %s2931_s11 = inlined_call_operand.vmem [shape: bf16[32,128], index: 11, kind: input, shape index: {}]   ;;  %s2932_s12 = inlined_call_operand.vmem [shape: f32[1,128], index: 12, kind: input, shape index: {}]   ;;  %s2933_s13 = inlined_call_operand.vmem [shape: bf16[128,32], index: 13, kind: input, shape index: {}]   ;;  %s2934_s14 = inlined_call_operand.vmem [shape: f32[1,32], index: 14, kind: input, shape index: {}]   ;;  %s2935_s15 = inlined_call_operand.vmem [shape: f32[1,32], index: 15, kind: input, shape index: {}]   ;;  %s2936_s16 = inlined_call_operand.vmem [shape: f32[1,32], index: 16, kind: input, shape index: {}]   ;;  %s2937_s17 = inlined_call_operand.hbm [shape: f32[2,8,32], index: 17, kind: output, shape index: {}]  }
   0x1   :  { %2943 = sst [smem:[#allocation19_spill]] %s2920_s0 }
   0x2   :  { %2944 = sst [smem:[#allocation20_spill]] %s2921_s1 }
   0x3   :  { %2945 = sst [smem:[#allocation21_spill]] %s2926_s6 }
   0x4   :  { %2946 = sst [smem:[#allocation22_spill]] %s2927_s7 }
   0x5   :  { %2947 = sst [smem:[#allocation23_spill]] %s2928_s8 }
   0x6   :  { %2948 = sst [smem:[#allocation24_spill]] %s2929_s9 }
   0x7   :  { %2949 = sst [smem:[#allocation25_spill]] %s2932_s12 }
   0x8   :  { %2950 = sst [smem:[#allocation26_spill]] %s2934_s14 }
   0x9   :  { %2951 = sst [smem:[#allocation27_spill]] %s2935_s15 }
   0xa   :  { %2952 = sst [smem:[#allocation28_spill]] %s2936_s16 }
   0xb   :  { %2953 = sst [smem:[#allocation29_spill]] %s2937_s17 }
   0xc   :  { %22 = vsyncpa [#allocation4], 0 }
   0xd   :  { %24 = vsyncpa [#allocation4 + $0x1], 0 }
   0xe   :  { %25 = vsyncpa [#allocation7], 0 }
   0xf   :  { %26 = vsyncpa [#allocation10], 0 }
  0x10   :  { %27 = vsyncpa [#allocation5], 0 }
  0x11   :  { %29 = vsyncpa [#allocation5 + $0x1], 0  ;;  %s2536_s24 = smov 0   ;;  %s2538_s25 = smov 0  }
  0x12   :  { %s2540_s26 = smov 0   ;;  %s2542_s27 = smov 0  }
  0x13   :  { %s2544_s28 = smov 0   ;;  %s2546_s29 = smov 0  }
  0x14 LB: > { %2954 = sst [smem:[#allocation17_spill]] %s2423_s28  ;;  %s2938_s0 = sadd.s32 4294967295, %s2427_s29   ;;  %s2427_s29 = sphi %s2546_s29, %s35_s29   ;;  %s2423_s28 = sphi %s2544_s28, %s2980_s28   ;;  %s2419_s27 = sphi %s2542_s27, %s2979_s27   ;;  %s2415_s26 = sphi %s2540_s26, %s2983_s26   ;;  %s2411_s25 = sphi %s2538_s25, %s2982_s25   ;;  %s2407_s24 = sphi %s2536_s24, %s2981_s24  }
  0x15   : > { %p1843_p0 = scmp.ge.s32.totalorder %s2427_s29, 1  ;;  %p2570_p1 = scmp.eq.s32.totalorder %s2938_s0, 0 }
  0x16   : > { %p459_p2 = scmp.lt.s32.totalorder %s2427_s29, 3  ;;  %s2429_s19 = smov [#allocation6]  }
  0x17   : > { %s477_s1 = sshll.u32 %s2429_s19, 4  ;;  %s2430_s21 = smov [#allocation9]   ;;  %s478_s1 = int_to_ptr.vmem [resolvable:$true] %s477_s1 }
  0x18   : > { %p2575_p3 = pnand %p1843_p0, %p459_p2  ;;  %s504_s22 = sshll.u32 %s2430_s21, 4  ;;  %s505_s22 = int_to_ptr.vmem [resolvable:$true] %s504_s22 }
  0x19   : > { %s2431_s23 = smov [#allocation8]   ;;  %s2218_s17 = scalar_lea.vmem %s478_s1, 256 }
  0x1a   : > { %s2956_s18 = scalar_select %p2575_p3, 1, 0 }
  0x1b   : > { %p2075_p4 = pneg %p2575_p3  ;;  %s490_s0 = sshll.u32 %s2431_s23, 4  ;;  %s491_s0 = int_to_ptr.vmem [resolvable:$true] %s490_s0 }
  0x1c   : > { %p2219_p8 = scmp.ne.s32.totalorder %s478_s1, %s2218_s17  ;;  %p2226_p11 = scmp.lt.s32.totalorder %s478_s1, %s478_s1 }
  0x1d   : > { %p2584_p6 = pnand %p2075_p4, %p2570_p1  ;;  %p2227_p12 = scmp.lt.s32.totalorder %s2218_s17, %s2218_s17 }
  0x1f   : > { %p2209_p7 = pneg %p2584_p6  ;;  %p2228_p13 = por %p2227_p12, %p2226_p11 }
  0x21   : > { %p2221_p9 = pnand %p2219_p8, %p2209_p7 }
  0x23   : > { %p2222_p10 = pneg %p2221_p9 }
  0x25   : > { %p2229_p0 = pnand %p2228_p13, %p2222_p10 }
  0x27   : > { %2232 = shalt.err (!%p2229_p0)
}
  0x28   : > { %s2432_s19 = smov 64   ;;  %s2433_s21 = smov 4  }
  0x29   : > { %s2958_s6 = sld [smem:[#allocation21_spill]]  ;;  %s2244_s15 = scalar_lea.vmem %s505_s22, 16 }
  0x2a   : > { %p2245_p2 = scmp.ne.s32.totalorder %s505_s22, %s2244_s15  ;;  %s2251_s14 = scalar_lea.vmem %s505_s22, 32 }
  0x2b   : > { %p2252_p9 = scmp.lt.s32.totalorder %s505_s22, %s505_s22  ;;  %p2253_p11 = scmp.lt.s32.totalorder %s2251_s14, %s2244_s15 }
  0x2c   : > { %p2247_p4 = pnand %p2245_p2, %p2209_p7 }
  0x2d   : > { %p2254_p10 = por %p2253_p11, %p2252_p9 }
  0x2e   : > { %p2248_p8 = pneg %p2247_p4 }
  0x2f   : > { %2078 = dma.hbm_to_vmem [thread:$0]  (!%p2584_p6), %s2958_s6, 256, %s478_s1, [#allocation7], %s2432_s19, %s2432_s19, %s2433_s21  }
  0x30   : > { %p2255_p12 = pnand %p2254_p10, %p2248_p8 }
  0x32   : > { %2258 = shalt.err (!%p2255_p12)
}
  0x33   : > { %s2959_s8 = sld [smem:[#allocation23_spill]]  ;;  %s2270_s16 = scalar_lea.vmem %s491_s0, 256 }
  0x34   : > { %p2271_p13 = scmp.ne.s32.totalorder %s491_s0, %s2270_s16  ;;  %p2278_p4 = scmp.lt.s32.totalorder %s491_s0, %s491_s0 }
  0x35   : > { %p2279_p5 = scmp.lt.s32.totalorder %s2270_s16, %s2270_s16 }
  0x36   : > { %p2273_p0 = pnand %p2271_p13, %p2209_p7 }
  0x37   : > { %p2280_p3 = por %p2279_p5, %p2278_p4 }
  0x38   : > { %p2274_p2 = pneg %p2273_p0 }
  0x39   : > { %2084 = dma.hbm_to_vmem [thread:$0]  (!%p2584_p6), %s2959_s8, 16, %s505_s22, [#allocation10]  }
  0x3a   : > { %p2281_p9 = pnand %p2280_p3, %p2274_p2 }
  0x3c   : > { %2284 = shalt.err (!%p2281_p9)
}
  0x3d   : > { %s2960_s7 = sld [smem:[#allocation22_spill]]  ;;  %s2434_s12 = smov [#allocation11]  }
  0x3e   : > { %s515_s1 = sshll.u32 %s2434_s12, 4  ;;  %s516_s1 = int_to_ptr.vmem [resolvable:$true] %s515_s1 }
  0x3f   : > { %s2296_s22 = scalar_lea.vmem %s516_s1, 16  ;;  %s2303_s23 = scalar_lea.vmem %s516_s1, 32 }
  0x40   : > { %p2297_p8 = scmp.ne.s32.totalorder %s516_s1, %s2296_s22  ;;  %p2304_p5 = scmp.lt.s32.totalorder %s516_s1, %s516_s1 }
  0x41   : > { %p2305_p3 = scmp.lt.s32.totalorder %s2303_s23, %s2296_s22 }
  0x42   : > { %p2299_p11 = pnand %p2297_p8, %p2209_p7 }
  0x43   : > { %2081 = dma.hbm_to_vmem [thread:$0]  (!%p2584_p6), %s2960_s7, 256, %s491_s0, [#allocation7], %s2432_s19, %s2432_s19, %s2433_s21  }
  0x44   : > { %p2300_p10 = pneg %p2299_p11  ;;  %p2306_p12 = por %p2305_p3, %p2304_p5 }
  0x46   : > { %p2307_p13 = pnand %p2306_p12, %p2300_p10 }
  0x48   : > { %2310 = shalt.err (!%p2307_p13)
}
  0x49   : > { %s2961_s9 = sld [smem:[#allocation24_spill]]  ;;  %s1842_s0 = sadd.s32 4294967294, %s2427_s29  }
  0x4a   : > { %s47_s19 = sadd.s32 1, %s2423_s28  ;;  %s134_s20 = sadd.s32 1, %s2415_s26 }
  0x4b   : > { %p49_p7 = scmp.ge.s32.totalorder %s47_s19, 2  ;;  %p141_p0 = scmp.ne.s32.totalorder %s2415_s26, %s2411_s25 }
  0x4c   : > { %p142_p2 = scmp.eq.s32.totalorder %s2427_s29, 0  ;;  %p147_p9 = scmp.ne.s32.totalorder %s2411_s25, %s2407_s24 }
  0x4d   : > { %s2985_s19 = smov (%p49_p7, %s47_s19), 0  ;;  %s2964_s15 = sadd.s32 4294967295, %s2427_s29  }
  0x4e   : > { %2962 = sst [smem:[#allocation18_spill]] %s2985_s19  ;;  %p2630_p4 = por %p142_p2, %p141_p0 }
  0x4f   : > { %2087 = dma.hbm_to_vmem [thread:$0]  (!%p2584_p6), %s2961_s9, 16, %s516_s1, [#allocation10]  }
  0x50   : > { %s131_s14 = ssub.s32 %s2423_s28, %s2985_s19  ;;  %p446_p6 = scmp.eq.s32.totalorder %s2964_s15, 1 }
  0x51   : > { %p132_p8 = scmp.eq.s32.totalorder %s131_s14, 0  ;;  %p2642_p11 = por %p2570_p1, %p147_p9 }
  0x52   : > { %p2646_p10 = por %p446_p6, %p141_p0  ;;  %p452_p5 = scmp.eq.s32.totalorder %s1842_s0, 1 }
  0x53   : > { %s2651_s22 = scalar_select %p132_p8, %s2415_s26, %s134_s20  }
  0x54   : > { %p2653_p3 = por %p452_p5, %p147_p9  ;;  %p2100_p12 = scmp.lt.s32.totalorder %s2427_s29, 2 }
  0x55   : > { %s571_s17 = sand.u32 1, %s2415_s26   ;;  %s1849_s16 = sshll.u32 %s2423_s28, 4 }
  0x56   : > { %s2967_s23 = scalar_select %p2653_p3, 1, 0 }
  0x57   : > { %s579_s6 = scalar_lea.hbm %s2923_s3, %s1849_s16  ;;  %s574_s7 = scalar_lea.vmem [#allocation3], %s571_s17 }
  0x58   : > { %s581_s8 = sshll.u32 %s574_s7, 4  ;;  %p2665_p13 = pnand %p2100_p12, %p2630_p4  ;;  %s582_s8 = int_to_ptr.vmem [resolvable:$true] %s581_s8 }
  0x59   : > { %s572_s0 = scalar_lea.sflag [#allocation4], %s571_s17  ;;  %s2324_s20 = scalar_lea.vmem %s582_s8, 16 }
  0x5a   : > { %p2313_p7 = pneg %p2665_p13  ;;  %p2325_p0 = scmp.ne.s32.totalorder %s582_s8, %s2324_s20 }
  0x5b   : > { %s2435_s19 = smov [#allocation3]  }
  0x5c   : > { %p2327_p2 = pnand %p2325_p0, %p2313_p7  ;;  %s2329_s28 = sshll.u32 %s2435_s19, 4  ;;  %s2330_s28 = int_to_ptr.vmem [resolvable:$false] %s2329_s28 }
  0x5d   : > { %s2331_s16 = scalar_lea.vmem %s2330_s28, 32  ;;  %p2332_p6 = scmp.lt.s32.totalorder %s582_s8, %s2330_s28 }
  0x5e   : > { %p2328_p9 = pneg %p2327_p2  ;;  %p2333_p8 = scmp.lt.s32.totalorder %s2331_s16, %s2324_s20 }
  0x60   : > { %p2334_p5 = por %p2333_p8, %p2332_p6 }
  0x62   : > { %p2335_p3 = pnand %p2334_p5, %p2328_p9 }
  0x64   : > { %2338 = shalt.err (!%p2335_p3)
}
  0x65   : > { %2091 = dma.hbm_to_vmem [thread:$0]  (!%p2665_p13), %s579_s6, 16, %s582_s8, %s572_s0  }
  0x66   : > { %p2969_p4 = scmp.ne.s32.totalorder %s2956_s18, 0 }
  0x67   : > { %s2676_s7 = sand.u32 (!%p2969_p4), 1, %s2411_s25  }
  0x68   : > { %590 = sbr.rel (%p2969_p4) target bundleno = 2518 (0x9d6), region = 88  ;;  %s593_s19 = scalar_lea.sflag (!%p2969_p4), [#allocation4], %s2676_s7 }
  0x69   : > { %s595_s21 = scalar_lea.vmem (!%p2969_p4), [#allocation3], %s2676_s7 }
  0x6d   : > { %2390 = dma.done.wait (%p2642_p11), %s593_s19, 16  }
  0x6e   : > { %2392 = vsyncadd (%p2642_p11), %s593_s19, 4294967280 }
  0x6f   : > { %2394 = dma.done.wait (%p2570_p1), [#allocation7], 512  }
  0x70   : > { %2396 = vsyncadd (%p2570_p1), [#allocation7], 4294966784 }
  0x71   : > { %2398 = dma.done.wait (%p2570_p1), [#allocation10], 32  }
  0x72   : > { %2400 = vsyncadd (%p2570_p1), [#allocation10], 4294967264  ;;  %p676_p3 = scmp.lt.s32.totalorder %s2419_s27, 1  ;;  %v2436_v0 = vmov 0.0   ;;  %vm2437_vm0 = vmmov 0   ;;  %s2970_s30 = sld [smem:[#allocation19_spill]]  ;;  %v929_v33 = vlaneseq }
  0x73   : > { %1947 = vmatprep.subr.bf16.mxu0 %v2436_v0  ;;  %1951 = vmatprep.mubr.msk.bf16.mxu0 %vm2437_vm0, %v2436_v0  ;;  %v2169_v1 = vld [vmem:[%s2924_s4 + $0x8] sm:$0xff]   ;;  %v2170_v2 = vld [vmem:[%s2924_s4] sm:$0xff]   ;;  %vm714_vm1 = vcmask 261120   ;;  %vm881_vm2 = vcmask 64512   ;;  %s2439_s12 = smov 120   ;;  %s2440_s17 = smov 104  }
  0x74   : > { %s677_s6 = scalar_select %p676_p3, %s2419_s27, 1  ;;  %1971 = vmatprep.subr.bf16.mxu1 %v2436_v0  ;;  %1973 = vmatprep.mubr.msk.bf16.mxu1 %vm2437_vm0, %v2436_v0  ;;  %v2171_v4 = vld [vmem:[%s2925_s5 + $0x8] sm:$0xff]   ;;  %v2172_v6 = vld [vmem:[%s2925_s5] sm:$0xff]   ;;  %v930_v35 = vshrl.u32 %v929_v33, 7  ;;  %v2441_v37 = vmov 0   ;;  %vm951_vm5 = vcmask 1043456  }
  0x75   : > { %1948 = vmatpush3.bf16.msra.mxu0 %v2169_v1  ;;  %v2173_v20 = vld [vmem:[#allocation6 + $0x8] sm:$0xff]   ;;  %v2174_v21 = vld [vmem:[#allocation6] sm:$0xff]   ;;  %v879_v34 = vld [vmem:[%s595_s21] sm:$0x1]  ;;  %vm996_vm6 = vcmask 60416   ;;  %s2442_s21 = smov 8  }
  0x76   : > { %s2700_s8 = sshll.u32 %s677_s6, 3  ;;  %1949 = vmatprep.subr.bf16.mxu0 %v2436_v0  ;;  %s2971_s6 = sld [smem:[#allocation20_spill]]  ;;  %vm880_vm3 = vcmp.eq.f32.partialorder %v879_v34, 0.0  ;;  %v931_v36 = vsub.s32 0, %v930_v35  ;;  %vm1120_vm7 = vcmask 126016   ;;  %vm1241_vm8 = vcmask 191616  }
  0x77   : > { %s690_s0 = scalar_lea.vmem %s2922_s2, %s2700_s8  ;;  %v928_v38 = vsel %vm880_vm3, 1, %v2441_v37  ;;  %s2444_s20 = smov 24   ;;  %vm1362_vm9 = vcmask 257216  }
  0x78   : > { %s682_s18 = scalar_lea.vmem %s2970_s30, %s2700_s8  ;;  %v696_v22 = vld [vmem:[%s690_s0] sm:$0xff]  ;;  %v932_v39 = vrot.slane %v928_v38, %v931_v36  ;;  %s2972_s14 = sld [smem:[#allocation25_spill]] }
  0x79   : > { %v2712_v3 = vld [vmem:[%s682_s18] sm:$0xff]  ;;  %1950 = vmatpush3.bf16.msra.mxu0 %v2170_v2  ;;  %s2438_s18 = smov 112   ;;  %v697_v23 = vpack.c.bf16 %v696_v22, %v696_v22  ;;  %s2974_s19 = sld [smem:[#allocation27_spill]] }
  0x7a   : > { %v693_v5 = vpack.c.bf16 %v2712_v3, %v2712_v3  ;;  %1955 = vmatprep.subr.bf16.mxu0 %v2436_v0  ;;  %vm933_vm4 = vcmp.eq.s32.totalorder %v932_v39, 1  ;;  %s2975_s28 = sld [smem:[#allocation28_spill]]  ;;  %s1901_s30 = sshll.u32 %s2419_s27, 7 }
  0x7b   : > { %s2976_s15 = sld [smem:[#allocation29_spill]]  ;;  %s2445_s16 = smov [#allocation12]  }
  0x7c   : > { %s686_s9 = scalar_lea.vmem %s2971_s6, %s2700_s8  ;;  %1952 = vmatmul.mubr.msk.bf16.vlgmr.msra.gmra.mxu0 %vm714_vm1, %v693_v5  ;;  %s2443_s8 = smov 16  }
  0x7d   : > { %v694_v7 = vld [vmem:[%s686_s9] sm:$0xff]  ;;  %1956 = vmatpush3.bf16.msra.mxu0 %v2171_v4  ;;  %1959 = vmatprep.mubr.msk.bf16.mxu0 %vm2437_vm0, %v2436_v0 }
  0x7e   : > { %1957 = vmatprep.subr.bf16.mxu0 %v2436_v0  ;;  %v695_v8 = vpack.c.bf16 %v694_v7, %v694_v7 }
  0x81   : > { %1958 = vmatpush3.bf16.msra.mxu0 %v2172_v6  ;;  %s1686_s0 = scalar_lea.hbm %s2976_s15, %s1901_s30 }
  0x82   : > { %1963 = vmatprep.subr.bf16.mxu0 %v2436_v0 }
  0x84   : > { %1960 = vmatmul.mubr.msk.bf16.vlgmr.msra.gmra.mxu0 %vm714_vm1, %v695_v8 }
  0x85   : > { %1967 = vmatprep.mubr.msk.bf16.mxu0 %vm2437_vm0, %v2436_v0  ;;  %1964 = vmatpush3.bf16.msra.mxu0 %v2173_v20 }
  0x86   : > { %1965 = vmatprep.subr.bf16.mxu0 %v2436_v0 }
  0x89   : > { %1966 = vmatpush3.bf16.msra.mxu0 %v2174_v21 }
  0x8a   : > { %1977 = vmatprep.subr.bf16.mxu0 %v2436_v0 }
  0x8c   : > { %1968 = vmatmul.mubr.msk.bf16.vlgmr.msra.gmra.mxu0 %vm714_vm1, %v697_v23 }
  0x8d   : > { %1979 = vmatprep.mubr.msk.bf16.mxu0 %vm2437_vm0, %v2436_v0 }
 0x13c   : > { %v752_v9 = vpop.f32.mrf.mxu0 }
 0x13d   : > { %v758_v18 = vpack.c.bf16 %v752_v9, %v752_v9 }
 0x13e   : > { %v1953_v10 = vpop.f32.mrf.mxu0 }
 0x140   : > { %v755_v11 = vpop.f32.mrf.mxu0 }
 0x142   : > { %v1954_v12 = vpop.f32.mrf.mxu0 }
 0x144   : > { %v812_v13 = vpop.f32.mrf.mxu0 }
 0x145   : > { %v818_v14 = vpack.c.bf16 %v812_v13, %v812_v13 }
 0x146   : > { %v1961_v15 = vpop.f32.mrf.mxu0 }
 0x147   : > { %1124 = vrot.lane.b32.xlu1 %v818_v14, %s2438_s18  ;;  %1002 = vrot.lane.b32.xlu0 %v818_v14, %s2439_s12  ;;  %v886_v16 = vsel %vm881_vm2, %v818_v14, 0 }
 0x148   : > { %v815_v17 = vpop.f32.mrf.mxu0  ;;  %1972 = vmatpush3.bf16.xpose.msra.mxu1 %v886_v16 }
 0x149   : > { %1983 = vmatprep.subr.bf16.mxu1 %v2436_v0 }
 0x14a   : > { %v1962_v19 = vpop.f32.mrf.mxu0 }
 0x14b   : > { %1122 = vrot.lane.b32.xlu1 %v758_v18, %s2438_s18  ;;  %999 = vrot.lane.b32.xlu0 %v758_v18, %s2439_s12 }
 0x14c   : > { %v872_v47 = vpop.f32.mrf.mxu0 }
 0x14d   : > { %v2775_v48 = vpack.c.bf16 %v872_v47, %v872_v47 }
 0x14e   : > { %v1969_v49 = vpop.f32.mrf.mxu0 }
 0x14f   : > { %1243 = vrot.lane.b32.xlu1 %v758_v18, %s2440_s17  ;;  %1245 = vrot.lane.b32.xlu0 %v818_v14, %s2440_s17  ;;  %v953_v50 = vsel %vm951_vm5, %v2775_v48, 0 }
 0x150   : > { %1974 = vmatmul.mubr.msk.bf16.vlgmr.msra.gmra.mxu1 %vm881_vm2, %v758_v18  ;;  %v875_v51 = vpop.f32.mrf.mxu0  ;;  %1978 = vmatpush3.bf16.msra.mxu0 %v953_v50 }
 0x151   : > { %1985 = vmatprep.mubr.msk.bf16.mxu1 %vm2437_vm0, %v2436_v0  ;;  %1989 = vmatprep.subr.bf16.mxu0 %v2436_v0 }
 0x152   : > { %v1970_v52 = vpop.f32.mrf.mxu0 }
 0x1b9   : > { %v1003_v24 = vpop.permute.xlu0 %1002  ;;  %v1125_v26 = vpop.permute.xlu1 %1124 }
 0x1ba   : > { %v1008_v25 = vsel %vm881_vm2, %v1003_v24, 0  ;;  %v1130_v28 = vsel %vm881_vm2, %v1125_v26, 0 }
 0x1bb   : > { %1984 = vmatpush3.bf16.xpose.msra.mxu1 %v1008_v25 }
 0x1bc   : > { %1995 = vmatprep.subr.bf16.mxu1 %v2436_v0 }
 0x1bd   : > { %v1000_v27 = vpop.permute.xlu0 %999  ;;  %v1123_v30 = vpop.permute.xlu1 %1122 }
 0x1c1   : > { %v1246_v29 = vpop.permute.xlu0 %1245  ;;  %v1244_v32 = vpop.permute.xlu1 %1243 }
 0x1c2   : > { %1986 = vmatmul.mubr.msk.bf16.vlgmr.msra.gmra.mxu1 %vm881_vm2, %v1000_v27  ;;  %v1251_v31 = vsel %vm881_vm2, %v1246_v29, 0 }
 0x1c3   : > { %1996 = vmatpush3.bf16.xpose.msra.mxu1 %v1130_v28  ;;  %1997 = vmatprep.mubr.msk.bf16.mxu1 %vm2437_vm0, %v2436_v0 }
 0x1c4   : > { %2007 = vmatprep.subr.bf16.mxu1 %v2436_v0 }
 0x1ca   : > { %1998 = vmatmul.mubr.msk.bf16.vlgmr.msra.gmra.mxu1 %vm881_vm2, %v1123_v30 }
 0x1cb   : > { %2008 = vmatpush3.bf16.xpose.msra.mxu1 %v1251_v31  ;;  %2009 = vmatprep.mubr.msk.bf16.mxu1 %vm2437_vm0, %v2436_v0 }
 0x1cc   : > { %2019 = vmatprep.subr.bf16.mxu1 %v2436_v0 }
 0x1d2   : > { %2010 = vmatmul.mubr.msk.bf16.vlgmr.msra.gmra.mxu1 %vm881_vm2, %v1244_v32 }
 0x1d3   : > { %2023 = vmatprep.mubr.msk.bf16.mxu1 %vm2437_vm0, %v2436_v0 }
 0x210   : > { %v922_v40 = vpop.f32.mrf.mxu1 }
 0x211   : > { %v934_v41 = vsel %vm933_vm4, -1e+20, %v922_v40 }
 0x212   : > { %v935_v42 = vmul.f32 0.17677669, %v934_v41  ;;  %v1975_v43 = vpop.f32.mrf.mxu1 }
 0x214   : > { %v925_v44 = vpop.f32.mrf.mxu1  ;;  %v936_v45 = vsel %vm881_vm2, %v935_v42, -inf }
 0x215   : > { %937 = vmax.xlane.f32.xlu0 %v936_v45 }
 0x216   : > { %v1976_v46 = vpop.f32.mrf.mxu1 }
 0x282   : > { %v1044_v53 = vpop.f32.mrf.mxu1 }
 0x283   : > { %v1050_v54 = vsel %vm933_vm4, -1e+20, %v1044_v53 }
 0x284   : > { %v1051_v55 = vmul.f32 0.17677669, %v1050_v54  ;;  %v1987_v56 = vpop.f32.mrf.mxu1 }
 0x286   : > { %v1047_v57 = vpop.f32.mrf.mxu1  ;;  %v1052_v58 = vsel %vm881_vm2, %v1051_v55, -inf }
 0x287   : > { %1053 = vmax.xlane.f32.xlu1 %v1052_v58 }
 0x288   : > { %v1988_v59 = vpop.f32.mrf.mxu1 }
 0x28a   : > { %v1166_v60 = vpop.f32.mrf.mxu1 }
 0x28b   : > { %v1172_v61 = vsel %vm933_vm4, -1e+20, %v1166_v60 }
 0x28c   : > { %v1173_v62 = vmul.f32 0.17677669, %v1172_v61  ;;  %v1999_v63 = vpop.f32.mrf.mxu1 }
 0x28e   : > { %v1169_v1 = vpop.f32.mrf.mxu1  ;;  %v1174_v2 = vsel %vm881_vm2, %v1173_v62, -inf }
 0x28f   : > { %1175 = vmax.xlane.f32.xlu0 %v1174_v2  ;;  %v2175_v1 = vld [vmem:[#allocation8 + $0x8] sm:$0xff]  }
 0x290   : > { %v2000_v4 = vpop.f32.mrf.mxu1  ;;  %2020 = vmatpush3.bf16.msra.mxu1 %v2175_v1 }
 0x291   : > { %v2176_v4 = vld [vmem:[#allocation8] sm:$0xff]   ;;  %2021 = vmatprep.subr.bf16.mxu1 %v2436_v0 }
 0x292   : > { %v1287_v5 = vpop.f32.mrf.mxu1 }
 0x293   : > { %v1293_v6 = vsel %vm933_vm4, -1e+20, %v1287_v5 }
 0x294   : > { %v1294_v7 = vmul.f32 0.17677669, %v1293_v6  ;;  %v2011_v8 = vpop.f32.mrf.mxu1  ;;  %2022 = vmatpush3.bf16.msra.mxu1 %v2176_v4 }
 0x295   : > { %2035 = vmatprep.subr.bf16.mxu1 %v2436_v0 }
 0x296   : > { %v1290_v9 = vpop.f32.mrf.mxu1  ;;  %v1295_v10 = vsel %vm881_vm2, %v1294_v7, -inf }
 0x297   : > { %1296 = vmax.xlane.f32.xlu0 %v1295_v10 }
 0x298   : > { %v2012_v11 = vpop.f32.mrf.mxu1 }
 0x29e   : > { %v938_v12 = vpop.xlane.xlu0 %937 }
 0x29f   : > { %v939_v13 = vsub.f32 %v935_v42, %v938_v12 }
 0x2a1   : > { %v940_v14 = vmul.f32 1.442695, %v939_v13 }
 0x2a3   : > { %2187 = vpow2.f32 %v940_v14 }
 0x2b0   : > { %v2188_v15 = vpop.eup %2187 }
 0x2b1   : > { %v942_v16 = vsel %vm881_vm2, %v2188_v15, 0.0 }
 0x2b2   : > { %943 = vadd.xlane.f32.xlu1 %v942_v16 }
 0x2c3   : > { %1065 = vrot.lane.b32.xlu1 %v2775_v48, %s2439_s12 }
 0x310   : > { %v1054_v17 = vpop.xlane.xlu1 %1053 }
 0x311   : > { %v1055_v18 = vsub.f32 %v1051_v55, %v1054_v17 }
 0x313   : > { %v1056_v19 = vmul.f32 1.442695, %v1055_v18  ;;  %v1879_v18 = vld [vmem:[#allocation9] ss:$0 sm:$0xff] }
 0x315   : > { %2189 = vpow2.f32 %v1056_v19 }
 0x318   : > { %v1176_v20 = vpop.xlane.xlu0 %1175 }
 0x319   : > { %v1177_v21 = vsub.f32 %v1173_v62, %v1176_v20 }
 0x31b   : > { %v1178_v22 = vmul.f32 1.442695, %v1177_v21 }
 0x31d   : > { %2191 = vpow2.f32 %v1178_v22 }
 0x320   : > { %v1297_v23 = vpop.xlane.xlu0 %1296 }
 0x321   : > { %v1298_v24 = vsub.f32 %v1294_v7, %v1297_v23 }
 0x322   : > { %v2190_v25 = vpop.eup %2189 }
 0x323   : > { %v1299_v26 = vmul.f32 1.442695, %v1298_v24  ;;  %v1058_v27 = vsel %vm881_vm2, %v2190_v25, 0.0 }
 0x324   : > { %1059 = vadd.xlane.f32.xlu0 %v1058_v27 }
 0x325   : > { %2193 = vpow2.f32 %v1299_v26 }
 0x32a   : > { %v2192_v28 = vpop.eup %2191 }
 0x32b   : > { %v1180_v29 = vsel %vm881_vm2, %v2192_v28, 0.0 }
 0x32c   : > { %1181 = vadd.xlane.f32.xlu1 %v1180_v29 }
 0x332   : > { %v2194_v30 = vpop.eup %2193 }
 0x333   : > { %v1301_v31 = vsel %vm881_vm2, %v2194_v30, 0.0 }
 0x334   : > { %1302 = vadd.xlane.f32.xlu0 %v1301_v31  ;;  %v2177_v31 = vld [vmem:[%s2931_s11 + $0x8] sm:$0xff]  }
 0x33b   : > { %v944_v32 = vpop.xlane.xlu1 %943 }
 0x33c   : > { %2195 = vrcp.f32 %v944_v32  ;;  %v2179_v32 = vld [vmem:[%s2933_s13 + $0x38] sm:$0xff]  }
 0x33d   : > { %1307 = vrot.lane.b32.xlu1 %v2775_v48, %s2440_s17 }
 0x33f   : > { %v1066_v34 = vpop.permute.xlu1 %1065 }
 0x340   : > { %v1071_v37 = vsel %vm951_vm5, %v1066_v34, 0  ;;  %v2181_v34 = vld [vmem:[%s2933_s13 + $0x28] sm:$0xff]  }
 0x349   : > { %v2196_v33 = vpop.eup %2195 }
 0x34a   : > { %1186 = vrot.lane.b32.xlu0 %v2775_v48, %s2438_s18  ;;  %v946_v35 = vmul.f32 %v2196_v33, %v2188_v15  ;;  %v2180_v33 = vld [vmem:[%s2933_s13 + $0x30] sm:$0xff]  }
 0x34c   : > { %v947_v36 = vpack.c.bf16 %v946_v35, %v946_v35  ;;  %v2182_v35 = vld [vmem:[%s2933_s13 + $0x20] sm:$0xff]  }
 0x34e   : > { %1980 = vmatmul.mubr.msk.bf16.vlgmr.msra.gmra.mxu0 %vm881_vm2, %v947_v36  ;;  %v2183_v36 = vld [vmem:[%s2933_s13 + $0x18] sm:$0xff]  }
 0x34f   : > { %1990 = vmatpush3.bf16.msra.mxu0 %v1071_v37  ;;  %1991 = vmatprep.mubr.msk.bf16.mxu0 %vm2437_vm0, %v2436_v0  ;;  %v2184_v37 = vld [vmem:[%s2933_s13 + $0x10] sm:$0xff]  }
 0x350   : > { %2001 = vmatprep.subr.bf16.mxu0 %v2436_v0 }
 0x3ad   : > { %v1060_v38 = vpop.xlane.xlu0 %1059 }
 0x3ae   : > { %2197 = vrcp.f32 %v1060_v38 }
 0x3b5   : > { %v1182_v39 = vpop.xlane.xlu1 %1181 }
 0x3b6   : > { %2199 = vrcp.f32 %v1182_v39 }
 0x3b9   : > { %v1308_v48 = vpop.permute.xlu1 %1307 }
 0x3ba   : > { %v1313_v50 = vsel %vm951_vm5, %v1308_v48, 0  ;;  %v2185_v48 = vld [vmem:[%s2933_s13 + $0x8] sm:$0xff]  }
 0x3bb   : > { %v2198_v40 = vpop.eup %2197 }
 0x3bc   : > { %v1062_v41 = vmul.f32 %v2198_v40, %v2190_v25 }
 0x3bd   : > { %v1303_v42 = vpop.xlane.xlu0 %1302 }
 0x3be   : > { %2201 = vrcp.f32 %v1303_v42  ;;  %v1063_v43 = vpack.c.bf16 %v1062_v41, %v1062_v41  ;;  %v1883_v42 = vld [vmem:[#allocation11] ss:$0 sm:$0xff] }
 0x3c0   : > { %1992 = vmatmul.mubr.msk.bf16.vlgmr.msra.gmra.mxu0 %vm881_vm2, %v1063_v43 }
 0x3c1   : > { %v1187_v44 = vpop.permute.xlu0 %1186  ;;  %2003 = vmatprep.mubr.msk.bf16.mxu0 %vm2437_vm0, %v2436_v0 }
 0x3c2   : > { %v1192_v45 = vsel %vm951_vm5, %v1187_v44, 0  ;;  %v1884_v44 = vld [vmem:[%s2930_s10] ss:$0 sm:$0xff] }
 0x3c3   : > { %v2200_v46 = vpop.eup %2199  ;;  %2002 = vmatpush3.bf16.msra.mxu0 %v1192_v45 }
 0x3c4   : > { %2013 = vmatprep.subr.bf16.mxu0 %v2436_v0  ;;  %v1184_v47 = vmul.f32 %v2200_v46, %v2192_v28 }
 0x3c6   : > { %v1185_v49 = vpack.c.bf16 %v1184_v47, %v1184_v47 }
 0x3c8   : > { %2004 = vmatmul.mubr.msk.bf16.vlgmr.msra.gmra.mxu0 %vm881_vm2, %v1185_v49  ;;  %v2186_v49 = vld [vmem:[%s2933_s13] sm:$0xff]  }
 0x3c9   : > { %2014 = vmatpush3.bf16.msra.mxu0 %v1313_v50  ;;  %2015 = vmatprep.mubr.msk.bf16.mxu0 %vm2437_vm0, %v2436_v0  ;;  %v1885_v50 = vld [vmem:[%s2972_s14] ss:$0 sm:$0xff] }
 0x3ca   : > { %2027 = vmatprep.subr.bf16.mxu0 %v2436_v0 }
 0x3cb   : > { %v2202_v51 = vpop.eup %2201 }
 0x3cc   : > { %v1305_v52 = vmul.f32 %v2202_v51, %v2194_v30 }
 0x3ce   : > { %v1306_v53 = vpack.c.bf16 %v1305_v52, %v1305_v52 }
 0x3d0   : > { %2016 = vmatmul.mubr.msk.bf16.vlgmr.msra.gmra.mxu0 %vm881_vm2, %v1306_v53 }
 0x3d1   : > { %2031 = vmatprep.mubr.msk.bf16.mxu0 %vm2437_vm0, %v2436_v0  ;;  %2028 = vmatpush3.bf16.msra.mxu0 %v2177_v31 }
 0x3d2   : > { %2029 = vmatprep.subr.bf16.mxu0 %v2436_v0 }
 0x40e   : > { %v989_v54 = vpop.f32.mrf.mxu0 }
 0x40f   : > { %v995_v55 = vpack.c.bf16 %v989_v54, %v989_v54 }
 0x410   : > { %v1981_v56 = vpop.f32.mrf.mxu0 }
 0x411   : > { %997 = vst.msk [vmem:[#allocation2] sm:$0xf] %vm996_vm6, %v995_v55 }
 0x412   : > { %v992_v57 = vpop.f32.mrf.mxu0 }
 0x414   : > { %v1982_v58 = vpop.f32.mrf.mxu0 }
 0x480   : > { %v1107_v59 = vpop.f32.mrf.mxu0 }
 0x481   : > { %v1904_v60 = vpack.c.bf16 %v1107_v59, %v1107_v59 }
 0x482   : > { %v1993_v61 = vpop.f32.mrf.mxu0 }
 0x483   : > { %1117 = vrot.lane.b32.xlu1 %v1904_v60, %s2442_s21  ;;  %s2973_s21 = sld [smem:[#allocation26_spill]] }
 0x484   : > { %v1110_v62 = vpop.f32.mrf.mxu0 }
 0x486   : > { %v1994_v63 = vpop.f32.mrf.mxu0 }
 0x488   : > { %v1228_v2 = vpop.f32.mrf.mxu0 }
 0x489   : > { %v1905_v5 = vpack.c.bf16 %v1228_v2, %v1228_v2 }
 0x48a   : > { %v2005_v6 = vpop.f32.mrf.mxu0 }
 0x48b   : > { %1238 = vrot.lane.b32.xlu0 %v1905_v5, %s2443_s8  ;;  %s1855_s8 = sshll.u32 %s2676_s7, 3 }
 0x48c   : > { %v1231_v7 = vpop.f32.mrf.mxu0  ;;  %s675_s18 = scalar_lea.vmem [#allocation12], %s1855_s8 }
 0x48d   : > { %s1688_s12 = sshll.u32 %s675_s18, 4  ;;  %s1689_s12 = int_to_ptr.vmem [resolvable:$true] %s1688_s12 }
 0x48e   : > { %v2006_v8 = vpop.f32.mrf.mxu0 }
 0x490   : > { %v1349_v9 = vpop.f32.mrf.mxu0 }
 0x491   : > { %v1906_v10 = vpack.c.bf16 %v1349_v9, %v1349_v9 }
 0x492   : > { %v2017_v11 = vpop.f32.mrf.mxu0 }
 0x493   : > { %1359 = vrot.lane.b32.xlu1 %v1906_v10, %s2444_s20  ;;  %s2339_s20 = scalar_lea.vmem %s1689_s12, 128 }
 0x494   : > { %v1352_v12 = vpop.f32.mrf.mxu0  ;;  %p2340_p1 = scmp.ne.s32.totalorder %s1689_s12, %s2339_s20 }
 0x495   : > { %v1898_v12 = vld [vmem:[%s2974_s19] ss:$0 sm:$0xff]  ;;  %s2343_s19 = sshll.u32 %s2445_s16, 4  ;;  %s2344_s19 = int_to_ptr.vmem [resolvable:$false] %s2343_s19 }
 0x496   : > { %v2018_v13 = vpop.f32.mrf.mxu0  ;;  %p2341_p11 = pnand %p2340_p1, %p2646_p10  ;;  %s2345_s27 = scalar_lea.vmem %s2344_s19, 256 }
 0x497   : > { %p2346_p13 = scmp.lt.s32.totalorder %s1689_s12, %s2344_s19  ;;  %p2347_p7 = scmp.lt.s32.totalorder %s2345_s27, %s2339_s20 }
 0x498   : > { %p2342_p12 = pneg %p2341_p11 }
 0x499   : > { %p2348_p0 = por %p2347_p7, %p2346_p13 }
 0x49b   : > { %p2349_p2 = pnand %p2348_p0, %p2342_p12 }
 0x4f5   : > { %v1118_v14 = vpop.permute.xlu1 %1117 }
 0x4f6   : > { %1121 = vst.msk [vmem:[#allocation2] sm:$0xf] %vm1120_vm7, %v1118_v14  ;;  %v1899_v14 = vld [vmem:[%s2975_s28] ss:$0 sm:$0xff] }
 0x4fd   : > { %v1239_v15 = vpop.permute.xlu0 %1238 }
 0x4fe   : > { %1242 = vst.msk [vmem:[#allocation2] sm:$0xf] %vm1241_vm8, %v1239_v15 }
 0x505   : > { %v1360_v16 = vpop.permute.xlu1 %1359 }
 0x506   : > { %1363 = vst.msk [vmem:[#allocation2] sm:$0xf] %vm1362_vm9, %v1360_v16 }
 0x50d   : > { %v1364_v17 = vld [vmem:[#allocation2] sm:$0xf] }
 0x50e   : > { %2024 = vmatmul.mubr.msk.bf16.vlgmr.msra.gmra.mxu1 %vm714_vm1, %v1364_v17 }
 0x50f   : > { %2051 = vmatprep.mubr.msk.bf16.mxu1 %vm2437_vm0, %v2436_v0  ;;  %2036 = vmatpush3.bf16.msra.mxu1 %v2179_v32 }
 0x510   : > { %2037 = vmatprep.subr.bf16.mxu1 %v2436_v0 }
 0x513   : > { %2038 = vmatpush3.bf16.msra.mxu1 %v2180_v33 }
 0x514   : > { %2039 = vmatprep.subr.bf16.mxu1 %v2436_v0 }
 0x517   : > { %2040 = vmatpush3.bf16.msra.mxu1 %v2181_v34 }
 0x518   : > { %2041 = vmatprep.subr.bf16.mxu1 %v2436_v0 }
 0x51b   : > { %2042 = vmatpush3.bf16.msra.mxu1 %v2182_v35 }
 0x51c   : > { %2043 = vmatprep.subr.bf16.mxu1 %v2436_v0 }
 0x51f   : > { %2044 = vmatpush3.bf16.msra.mxu1 %v2183_v36 }
 0x520   : > { %2045 = vmatprep.subr.bf16.mxu1 %v2436_v0 }
 0x523   : > { %2046 = vmatpush3.bf16.msra.mxu1 %v2184_v37 }
 0x524   : > { %2047 = vmatprep.subr.bf16.mxu1 %v2436_v0 }
 0x527   : > { %2048 = vmatpush3.bf16.msra.mxu1 %v2185_v48 }
 0x528   : > { %2049 = vmatprep.subr.bf16.mxu1 %v2436_v0  ;;  %v1889_v0 = vld [vmem:[%s2973_s21] ss:$0 sm:$0xff]  ;;  %s1674_s21 = scalar_lea.sflag [#allocation5], %s2676_s7 }
 0x52b   : > { %2050 = vmatpush3.bf16.msra.mxu1 %v2186_v49 }
 0x5ce   : > { %v1425_v19 = vpop.f32.mrf.mxu1 }
 0x5cf   : > { %v1426_v20 = vadd.f32 %v1879_v18, %v1425_v19 }
 0x5d0   : > { %v2025_v21 = vpop.f32.mrf.mxu1 }
 0x5d1   : > { %v1431_v22 = vadd.f32 %v1426_v20, %v2712_v3  ;;  %v2178_v3 = vld [vmem:[%s2931_s11] sm:$0xff]  }
 0x5d2   : > { %v1428_v23 = vpop.f32.mrf.mxu1  ;;  %2030 = vmatpush3.bf16.msra.mxu0 %v2178_v3 }
 0x5d3   : > { %v1434_v24 = vsel %vm714_vm1, %v1431_v22, 0.0 }
 0x5d4   : > { %1435 = vadd.xlane.f32.xlu0 %v1434_v24  ;;  %v2026_v25 = vpop.f32.mrf.mxu1 }
 0x65d   : > { %v1436_v26 = vpop.xlane.xlu0 %1435 }
 0x65e   : > { %v1438_v27 = vmul.f32 0.03125, %v1436_v26 }
 0x660   : > { %v1439_v28 = vsub.f32 %v1431_v22, %v1438_v27 }
 0x662   : > { %v1440_v29 = vmul.f32 %v1439_v28, %v1439_v28 }
 0x664   : > { %v1441_v30 = vsel %vm714_vm1, %v1440_v29, 0.0 }
 0x665   : > { %1442 = vadd.xlane.f32.xlu1 %v1441_v30 }
 0x6ee   : > { %v1443_v38 = vpop.xlane.xlu1 %1442 }
 0x6ef   : > { %v1444_v39 = vmul.f32 0.03125, %v1443_v38 }
 0x6f1   : > { %v1445_v40 = vadd.f32 1e-05, %v1444_v39 }
 0x6f3   : > { %2203 = vrsqrt.f32 %v1445_v40 }
 0x700   : > { %v2204_v41 = vpop.eup %2203 }
 0x701   : > { %v1447_v43 = vmul.f32 %v2204_v41, %v1439_v28 }
 0x703   : > { %v1454_v45 = vmul.f32 %v1883_v42, %v1447_v43 }
 0x705   : > { %v1461_v46 = vadd.f32 %v1884_v44, %v1454_v45 }
 0x707   : > { %v1462_v47 = vpack.c.bf16 %v1461_v46, %v1461_v46 }
 0x709   : > { %2032 = vmatmul.mubr.msk.bf16.vlgmr.msra.gmra.mxu0 %vm714_vm1, %v1462_v47 }
 0x7c9   : > { %v1523_v51 = vpop.f32.mrf.mxu0 }
 0x7ca   : > { %v1524_v52 = vadd.f32 %v1885_v50, %v1523_v51 }
 0x7cb   : > { %v2033_v53 = vpop.f32.mrf.mxu0 }
 0x7cc   : > { %v1529_v54 = vmax.f32 %v1524_v52, 0.0 }
 0x7cd   : > { %v1526_v55 = vpop.f32.mrf.mxu0 }
 0x7ce   : > { %v1530_v56 = vpack.c.bf16 %v1529_v54, %v1529_v54 }
 0x7cf   : > { %v2034_v57 = vpop.f32.mrf.mxu0 }
 0x7d0   : > { %2052 = vmatmul.mubr.bf16.vlgmr.msra.gmra.mxu1 %v1530_v56 }
 0x890   : > { %v1636_v58 = vpop.f32.mrf.mxu1 }
 0x891   : > { %v1637_v59 = vadd.f32 %v1889_v0, %v1636_v58 }
 0x892   : > { %v2053_v60 = vpop.f32.mrf.mxu1 }
 0x893   : > { %v1642_v61 = vadd.f32 %v1637_v59, %v1461_v46 }
 0x894   : > { %v1639_v62 = vpop.f32.mrf.mxu1 }
 0x895   : > { %v1645_v63 = vsel %vm714_vm1, %v1642_v61, 0.0 }
 0x896   : > { %1646 = vadd.xlane.f32.xlu0 %v1645_v63  ;;  %v2054_v1 = vpop.f32.mrf.mxu1 }
 0x91f   : > { %v1647_v2 = vpop.xlane.xlu0 %1646 }
 0x920   : > { %v1648_v4 = vmul.f32 0.03125, %v1647_v2 }
 0x922   : > { %v1649_v5 = vsub.f32 %v1642_v61, %v1648_v4 }
 0x924   : > { %v1650_v6 = vmul.f32 %v1649_v5, %v1649_v5 }
 0x926   : > { %v1651_v7 = vsel %vm714_vm1, %v1650_v6, 0.0 }
 0x927   : > { %1652 = vadd.xlane.f32.xlu0 %v1651_v7 }
 0x9b0   : > { %v1653_v8 = vpop.xlane.xlu0 %1652 }
 0x9b1   : > { %v1654_v9 = vmul.f32 0.03125, %v1653_v8 }
 0x9b3   : > { %v1655_v10 = vadd.f32 1e-05, %v1654_v9 }
 0x9b5   : > { %2205 = vrsqrt.f32 %v1655_v10 }
 0x9c2   : > { %v2206_v11 = vpop.eup %2205 }
 0x9c3   : > { %v1657_v13 = vmul.f32 %v2206_v11, %v1649_v5 }
 0x9c5   : > { %v1664_v15 = vmul.f32 %v1898_v12, %v1657_v13 }
 0x9c7   : > { %v1671_v16 = vadd.f32 %v1899_v14, %v1664_v15 }
 0x9c9   : > { %1672 = vst.msk [vmem:[%s675_s18] sm:$0xff] %vm714_vm1, %v1671_v16 }
 0x9ca   : > { %2352 = shalt.err (!%p2349_p2)
}
 0x9cb   : > { %s2353_s8 = scalar_lea.hbm %s1686_s0, 128  ;;  %s2357_s9 = scalar_lea.hbm %s2976_s15, 256 }
 0x9cc   : > { %p2354_p9 = scmp.ne.s32.totalorder %s1686_s0, %s2353_s8  ;;  %p2358_p5 = scmp.lt.s32.totalorder %s1686_s0, %s2976_s15 }
 0x9cd   : > { %p2359_p4 = scmp.lt.s32.totalorder %s2357_s9, %s2353_s8 }
 0x9ce   : > { %p2355_p6 = pnand %p2354_p9, %p2646_p10 }
 0x9cf   : > { %p2360_p3 = por %p2359_p4, %p2358_p5 }
 0x9d0   : > { %p2356_p8 = pneg %p2355_p6 }
 0x9d2   : > { %p2361_p1 = pnand %p2360_p3, %p2356_p8 }
 0x9d4   : > { %2364 = shalt.err (!%p2361_p1)
}
 0x9d5   : > { %2073 = dma.vmem_to_hbm [thread:$0]  (%p2646_p10), %s1689_s12, 128, %s1686_s0, %s1674_s21  }
 0x9d6 PF: > { %s1700_s18 = sand.u32 1, %s2407_s24   ;;  %p2977_p11 = scmp.ne.s32.totalorder %s2967_s23, 0 }
 0x9d7   : > { %p2978_p12 = scmp.ge.s32.totalorder %s2427_s29, 2  ;;  %s1701_s17 = scalar_lea.sflag [#allocation5], %s1700_s18 }
 0x9d9   : > { %p2093_p13 = pnand %p2978_p12, %p2977_p11 }
 0x9db   : > { %p2094_p7 = pneg %p2093_p13 }
 0x9dd   : > { %2402 = dma.done.wait (%p2094_p7), %s1701_s17, 128  }
 0x9de   : > { %2404 = vsyncadd (%p2094_p7), %s1701_s17, 4294967168  ;;  %s35_s29 = sadd.s32 1, %s2427_s29   ;;  %s2979_s27 = sld [smem:[#allocation17_spill]] }
 0x9df   : > { %p32_p0 = scmp.ge.s32.totalorder %s35_s29, 4   ;;  %s2980_s28 = sld [smem:[#allocation18_spill]] }
 0x9e0   : > { %s2981_s24 = smov %s2411_s25  ;;  %s2982_s25 = smov %s2415_s26 }
 0x9e1   : > { %s2983_s26 = smov %s2651_s22  ;;  %34 = sbr.rel (!%p32_p0) target bundleno = 20 (0x14), region = 158 }
 0x9e6   :  { %1706 = vsyncpa [#allocation4], 1 }
 0x9e7   :  { %1708 = vsyncpa [#allocation4 + $0x1], 1 }
 0x9e8   :  { %1709 = vsyncpa [#allocation7], 1 }
 0x9e9   :  { %1710 = vsyncpa [#allocation10], 1 }
 0x9ea   :  { %1711 = vsyncpa [#allocation5], 1 }
 0x9eb   :  { %1713 = vsyncpa [#allocation5 + $0x1], 1 }

</bundles_post_ra>
